<compile_context>
chip_gen: v7x
topology: tpu7x:2x2x1
jax: 0.10.0
libtpu: 0.0.40
codegen_flags: <defaults>
</compile_context>

<pallas_src>
import numpy as np
import jax
import jax.numpy as jnp
from jax.experimental import pallas as pl
from jax.experimental.pallas import tpu as pltpu

LANE = 128


def _round_up(n, m):
    return ((n + m - 1) // m) * m


def _pad2d(a, rows, cols, row_off=0, col_off=0):
    """Place 2-D array `a` into a zero (rows, cols) array at (row_off, col_off)."""
    out = jnp.zeros((rows, cols), a.dtype)
    return out.at[row_off:row_off + a.shape[0], col_off:col_off + a.shape[1]].set(a)


def _tensorcores_per_chip():
    """Best-effort detection of dual-TensorCore chips (v4/v5p/v7x); fallback 1."""
    try:
        kind = jax.devices()[0].device_kind.lower()
    except Exception:
        return 1
    if "v7" in kind or "v4" in kind or "v5p" in kind:
        return 2
    return 1


def _pick_tb(B, cores, cap=1024):
    """Batch tile: multiple of 8 sublanes, as large as possible up to `cap`,
    but with at least `cores` grid tiles so megacore chips keep both cores busy."""
    B8 = _round_up(max(B, 8), 8)
    if cores > 1:
        per_core = _round_up(-(-B8 // cores), 8)
        tb = min(cap, per_core)
    else:
        tb = min(cap, B8)
    return max(tb, 8)


# ---------------------------------------------------------------------------
# Pallas kernel
# ---------------------------------------------------------------------------
def _make_sian_kernel(cfg):
    """Fused SIAN forward: DNN branch + GAM branch -> one narrow (tb, d_out+1) output."""
    fuse0 = cfg["fuse0"]              # layer-0 of both branches fused into one matmul
    dnn_last = cfg["dnn_last"]        # DNN branch present (dnn_on)
    n_dnn_hidden = cfg["n_dnn_hidden"]
    n_gam_pre = cfg["n_gam_pre"]
    p_split = cfg["p_split"]          # lane split point of the fused layer-0 output
    out_cols = cfg["d_out"] + 1       # valid output columns (dnn_out | gam_out)

    def kernel(*refs):
        it = iter(refs)
        x = next(it)[...]                                # (tb, F) f32

        def dense(a, w_ref, b_ref):
            # Cast activation to the weight dtype (bf16 fast path), accumulate in f32.
            w = w_ref[...]
            acc = jnp.dot(a.astype(w.dtype), w, preferred_element_type=jnp.float32)
            return acc + b_ref[...].astype(jnp.float32)

        if fuse0:
            f = jnp.maximum(dense(x, next(it), next(it)), 0.0)   # both branches ReLU@0
            h = f[:, :p_split]                                   # 128-aligned split
            g = f[:, p_split:]
        else:
            h = x
            g = x

        # DNN hidden ReLU layers (MuP scales already folded into the weights).
        for _ in range(n_dnn_hidden):
            h = jnp.maximum(dense(h, next(it), next(it)), 0.0)

        out = None
        if dnn_last:
            # Last DNN layer, routed to output columns [0 : d_out].
            out = dense(h, next(it), next(it))
        # else: DNN is off -> its output columns are exactly zero (== dnn(x)*0).
        # TODO(synk): skipping the dead DNN chain loses NaN/Inf propagation of dnn(x)*0.

        # GAM hidden ReLU layers.
        for _ in range(n_gam_pre):
            g = jnp.maximum(dense(g, next(it), next(it)), 0.0)

        # Last GAM layer: sum-over-groups + gam_bias folded into (W @ 1, sum(b)+bias),
        # routed to output column d_out.
        gres = dense(g, next(it), next(it))
        out = gres if out is None else out + gres

        out_ref = next(it)
        # Narrow store: only the (tb, d_out+1) meaningful columns go back to HBM.
        out_ref[...] = out[:, :out_cols].astype(out_ref.dtype)

    return kernel


# ---------------------------------------------------------------------------
# Parameter preparation (one-time, not per forward call)
# ---------------------------------------------------------------------------
def prepare_sian_params(dnn_params, gam_params, gam_bias, dnn_sizes, dnn_on,
                        param_dtype=jnp.float32):
    """Fold scalars/reductions into weights and pad everything to 128-lane tiles.

    param_dtype=jnp.bfloat16 stores weights/biases in bf16 for MXU-native matmuls
    (activations are cast in-kernel, accumulation stays f32)."""
    n_dnn = len(dnn_params)
    n_gam = len(gam_params)
    d_out = int(dnn_sizes[-1])
    out_w = _round_up(d_out + 1, LANE)        # lane-padded width of the packed last layer

    feat_in = gam_params[0][0].shape[0]

    # --- fold MuP scales into DNN layer 0 / last layer ---
    dnn = [(w, b) for (w, b) in dnn_params]
    if dnn_on:
        s1 = float(np.sqrt(dnn_sizes[1]))
        w0, b0 = dnn[0]
        dnn[0] = (w0 * s1, b0 * s1)
        sl = float(np.sqrt(dnn_sizes[n_dnn - 1]))
        wl, bl = dnn[n_dnn - 1]
        dnn[n_dnn - 1] = (wl / sl, bl / sl)

    # --- fold the GAM final sum-over-groups and gam_bias into the last GAM layer ---
    gam = [(w, b) for (w, b) in gam_params]
    wl, bl = gam[n_gam - 1]                                   # (in, n_groups), (1, n_groups)
    gam[n_gam - 1] = (jnp.sum(wl, axis=1, keepdims=True),     # (in, 1)
                      (jnp.sum(bl) + gam_bias[0]).reshape(1, 1))

    fuse0 = bool(dnn_on) and n_dnn >= 2 and n_gam >= 2

    arrays = []
    if fuse0:
        wd0, bd0 = dnn[0]
        wg0, bg0 = gam[0]
        p_d1 = _round_up(wd0.shape[1], LANE)
        p_g1 = _round_up(wg0.shape[1], LANE)
        arrays.append(jnp.concatenate(
            [_pad2d(wd0, feat_in, p_d1), _pad2d(wg0, feat_in, p_g1)], axis=1))
        arrays.append(jnp.concatenate(
            [_pad2d(bd0, 1, p_d1), _pad2d(bg0, 1, p_g1)], axis=1))
        h_w, g_w = p_d1, p_g1
        dnn_rest, gam_rest = dnn[1:], gam[1:]
        p_split = p_d1
    else:
        h_w = g_w = feat_in
        dnn_rest = dnn if dnn_on else []
        gam_rest = gam
        p_split = 0

    # DNN hidden (ReLU) layers, padded to (prev_pad, next_pad).
    n_dnn_hidden = max(len(dnn_rest) - 1, 0)
    for (w, b) in dnn_rest[:n_dnn_hidden]:
        p_out = _round_up(w.shape[1], LANE)
        arrays += [_pad2d(w, h_w, p_out), _pad2d(b, 1, p_out)]
        h_w = p_out
    dnn_last = len(dnn_rest) >= 1
    if dnn_last:
        w, b = dnn_rest[-1]                                   # -> output cols [0:d_out]
        arrays += [_pad2d(w, h_w, out_w), _pad2d(b, 1, out_w)]

    # GAM hidden (ReLU) layers.
    n_gam_pre = max(len(gam_rest) - 1, 0)
    for (w, b) in gam_rest[:n_gam_pre]:
        p_out = _round_up(w.shape[1], LANE)
        arrays += [_pad2d(w, g_w, p_out), _pad2d(b, 1, p_out)]
        g_w = p_out
    w, b = gam_rest[-1]                                       # -> output col d_out
    arrays += [_pad2d(w, g_w, out_w, col_off=d_out),
               _pad2d(b, 1, out_w, col_off=d_out)]

    arrays = [a.astype(param_dtype) for a in arrays]

    cfg = dict(fuse0=fuse0, dnn_last=dnn_last, n_dnn_hidden=n_dnn_hidden,
               n_gam_pre=n_gam_pre, p_split=p_split, d_out=d_out)
    return arrays, cfg


# ---------------------------------------------------------------------------
# Wrapper
# ---------------------------------------------------------------------------
def sian_forward(x, packed_arrays, cfg, n_groups, *, tb_cap=1024):
    B, F = x.shape
    d_out = cfg["d_out"]
    out_cols = d_out + 1

    # Core-aware batch tile (>=2 tiles on dual-TC chips, else one big tile, cap 1024).
    cores = _tensorcores_per_chip()
    tb = _pick_tb(B, cores, tb_cap)
    B_pad = _round_up(B, tb)
    x_p = jnp.pad(x, ((0, B_pad - B), (0, 0))) if B_pad != B else x

    kernel = _make_sian_kernel(cfg)
    in_specs = [pl.BlockSpec((tb, F), lambda i: (i, 0))]
    in_specs += [pl.BlockSpec(a.shape, lambda i: (0, 0)) for a in packed_arrays]

    out = pl.pallas_call(
        kernel,
        out_shape=jax.ShapeDtypeStruct((B_pad, out_cols), x.dtype),
        grid=(B_pad // tb,),
        in_specs=in_specs,
        out_specs=pl.BlockSpec((tb, out_cols), lambda i: (i, 0)),
        compiler_params=pltpu.CompilerParams(
            dimension_semantics=("parallel",),
            vmem_limit_bytes=32 * 1024 * 1024),
    )(x_p, *packed_arrays)

    dnn_h = out[:B, :d_out]
    gam_h = out[:B, d_out:d_out + 1]
    # shape_loss is a constant zeros(len(indices)) in the reference module (glue).
    shape_loss = jnp.zeros((n_groups,), x.dtype)
    return dnn_h, gam_h, shape_loss


# ---------------------------------------------------------------------------
# Deterministic parameter construction (mirrors the module __init__ structure)
# ---------------------------------------------------------------------------
def build_gam_masks(feat_in, all_indices, small_sizes):
    length = len(small_sizes) - 1
    n = len(all_indices)
    sizes = [feat_in] + [n * small_sizes[k] for k in range(1, length + 1)]
    masks = []
    for k in range(length):
        mask = np.zeros((sizes[k + 1], sizes[k]), np.float32)
        size_k1 = 0
        size_k2 = 0
        for j, index in enumerate(all_indices):
            curr_k2 = small_sizes[k + 1]
            if k == 0:
                for i in index:
                    mask[size_k2:size_k2 + curr_k2, i] = 1.0
            else:
                curr_k1 = small_sizes[k]
                mask[size_k2:size_k2 + curr_k2, size_k1:size_k1 + curr_k1] = 1.0
                size_k1 += curr_k1
            size_k2 += curr_k2
        masks.append(mask)
    return sizes, masks


def init_params(key, sizes_arg, indices, dnn_on, small_sizes):
    # SIAN.__init__: if dnn off, sizes -> [sizes[0], sizes[-1]]
    dnn_sizes = list(sizes_arg) if dnn_on else [sizes_arg[0], sizes_arg[-1]]
    feat_in = sizes_arg[0]

    # --- MuP_Relu_DNN: kaiming-normal(fan_in, relu) weights, zero biases ---
    dnn_params = []
    for k in range(len(dnn_sizes) - 1):
        fan_in, fan_out = dnn_sizes[k], dnn_sizes[k + 1]
        key, sub = jax.random.split(key)
        w = jax.random.normal(sub, (fan_out, fan_in), jnp.float32) * np.sqrt(2.0 / fan_in)
        b = jnp.zeros((fan_out,), jnp.float32)
        dnn_params.append((jnp.asarray(w.T), b.reshape(1, -1)))  # store (in,out), (1,out)

    # --- Blocksparse_Deep_Relu_GAM: default Linear init, masked, sqrt(n_groups) scale ---
    gam_sizes, masks = build_gam_masks(feat_in, indices, small_sizes)
    n_groups = len(indices)
    gam_params = []
    for k in range(len(small_sizes) - 1):
        fan_in, fan_out = gam_sizes[k], gam_sizes[k + 1]
        bound = 1.0 / np.sqrt(fan_in)
        key, kw, kb = jax.random.split(key, 3)
        w = jax.random.uniform(kw, (fan_out, fan_in), jnp.float32, -bound, bound)
        b = jax.random.uniform(kb, (fan_out,), jnp.float32, -bound, bound)
        w = w * masks[k]
        if k != 0:
            w = w * np.sqrt(n_groups)
            b = b * np.sqrt(n_groups)
        gam_params.append((jnp.asarray(w.T), b.reshape(1, -1)))

    gam_bias = jnp.zeros((1,), jnp.float32)   # self.bias = Parameter(zeros(1))
    return dnn_params, gam_params, gam_bias, dnn_sizes, gam_sizes


# ---------------------------------------------------------------------------
# Pure-JAX reference (unfused / unfolded, matches the PyTorch module)
# ---------------------------------------------------------------------------
def sian_ref(x, dnn_params, gam_params, gam_bias, dnn_sizes, dnn_on, n_groups):
    n_dnn = len(dnn_params)
    h = x
    for k, (w, b) in enumerate(dnn_params):
        h = h @ w + b
        if k == 0:
            h = h * np.sqrt(dnn_sizes[1])
        if k != n_dnn - 1:
            h = jnp.maximum(h, 0.0)
        else:
            h = h / np.sqrt(dnn_sizes[k])
    if not dnn_on:
        h = h * 0.0
    n_gam = len(gam_params)
    g = x
    for k, (w, b) in enumerate(gam_params):
        g = g @ w + b
        if k != n_gam - 1:
            g = jnp.maximum(g, 0.0)
    gam_h = jnp.sum(g, axis=1, keepdims=True) + gam_bias[0]
    return h, gam_h, jnp.zeros((n_groups,), x.dtype)


# ---------------------------------------------------------------------------
if __name__ == "__main__":
    key = jax.random.PRNGKey(0)

    # 8 input features, DNN [8, 32, 1], 3 feature groups,
    # GAM small_sizes [0, 16, 12, 8, 1]  =>  GAM sizes [8, 48, 36, 24, 3].
    sizes = [8, 32, 1]
    indices = [(0, 1), (2, 3, 4), (5, 6, 7)]
    small_sizes = [0, 16, 12, 8, 1]
    B = 512  # -> 2 x 256-row tiles on dual-TC chips, 1 x 512-row tile otherwise

    key, kx = jax.random.split(key)
    x = jax.random.normal(kx, (B, sizes[0]), jnp.float32)

    for dnn_on in (True, False):
        dnn_params, gam_params, gam_bias, dnn_sizes, _ = init_params(
            jax.random.PRNGKey(1), sizes, indices, dnn_on, small_sizes)

        rd, rg, rs = sian_ref(x, dnn_params, gam_params, gam_bias, dnn_sizes,
                              dnn_on, len(indices))

        # --- f32 weights: exact reference semantics ---
        packed, cfg = prepare_sian_params(
            dnn_params, gam_params, gam_bias, dnn_sizes, dnn_on,
            param_dtype=jnp.float32)
        dnn_h, gam_h, shape_loss = sian_forward(x, packed, cfg, len(indices))
        jax.block_until_ready((dnn_h, gam_h, shape_loss))

        assert dnn_h.shape == (B, dnn_sizes[-1]) and gam_h.shape == (B, 1)
        assert shape_loss.shape == (len(indices),)
        np.testing.assert_allclose(np.asarray(dnn_h), np.asarray(rd),
                                   rtol=1e-5, atol=1e-5)
        np.testing.assert_allclose(np.asarray(gam_h), np.asarray(rg),
                                   rtol=1e-5, atol=1e-5)
        np.testing.assert_allclose(np.asarray(shape_loss), np.asarray(rs), atol=0)

        # --- bf16 weights (MXU fast path), f32 accumulation, looser tolerance ---
        packed16, cfg16 = prepare_sian_params(
            dnn_params, gam_params, gam_bias, dnn_sizes, dnn_on,
            param_dtype=jnp.bfloat16)
        d16, g16, _ = sian_forward(x, packed16, cfg16, len(indices))
        jax.block_until_ready((d16, g16))
        np.testing.assert_allclose(np.asarray(d16), np.asarray(rd),
                                   rtol=5e-2, atol=5e-2)
        np.testing.assert_allclose(np.asarray(g16), np.asarray(rg),
                                   rtol=5e-2, atol=5e-2)

    print("KERNEL_OK")
</pallas_src>

<mosaic_0001>
module attributes {stable_mosaic.version = 11 : i64} {
  func.func @kernel(%arg0: i32, %arg1: memref<512x8xf32, #tpu.memory_space<vmem>>, %arg2: memref<8x256xf32, #tpu.memory_space<vmem>>, %arg3: memref<1x256xf32, #tpu.memory_space<vmem>>, %arg4: memref<128x128xf32, #tpu.memory_space<vmem>>, %arg5: memref<1x128xf32, #tpu.memory_space<vmem>>, %arg6: memref<128x128xf32, #tpu.memory_space<vmem>>, %arg7: memref<1x128xf32, #tpu.memory_space<vmem>>, %arg8: memref<128x128xf32, #tpu.memory_space<vmem>>, %arg9: memref<1x128xf32, #tpu.memory_space<vmem>>, %arg10: memref<128x128xf32, #tpu.memory_space<vmem>>, %arg11: memref<1x128xf32, #tpu.memory_space<vmem>>, %arg12: memref<512x2xf32, #tpu.memory_space<vmem>>) attributes {dimension_semantics = [#tpu.dimension_semantics<parallel>], iteration_bounds = array<i64: 1>, scalar_prefetch = 0 : i64, scratch_operands = 0 : i64, tpu.core_type = #tpu.core_type<tc>, window_params = [{transform_indices = @transform_0, window_bounds = array<i64: 512, 8>}, {pipeline_mode = #tpu.pipeline_mode<synchronous>, transform_indices = @transform_1, window_bounds = array<i64: 8, 256>}, {pipeline_mode = #tpu.pipeline_mode<synchronous>, transform_indices = @transform_2, window_bounds = array<i64: 1, 256>}, {pipeline_mode = #tpu.pipeline_mode<synchronous>, transform_indices = @transform_3, window_bounds = array<i64: 128, 128>}, {pipeline_mode = #tpu.pipeline_mode<synchronous>, transform_indices = @transform_4, window_bounds = array<i64: 1, 128>}, {pipeline_mode = #tpu.pipeline_mode<synchronous>, transform_indices = @transform_5, window_bounds = array<i64: 128, 128>}, {pipeline_mode = #tpu.pipeline_mode<synchronous>, transform_indices = @transform_6, window_bounds = array<i64: 1, 128>}, {pipeline_mode = #tpu.pipeline_mode<synchronous>, transform_indices = @transform_7, window_bounds = array<i64: 128, 128>}, {pipeline_mode = #tpu.pipeline_mode<synchronous>, transform_indices = @transform_8, window_bounds = array<i64: 1, 128>}, {pipeline_mode = #tpu.pipeline_mode<synchronous>, transform_indices = @transform_9, window_bounds = array<i64: 128, 128>}, {pipeline_mode = #tpu.pipeline_mode<synchronous>, transform_indices = @transform_10, window_bounds = array<i64: 1, 128>}, {transform_indices = @transform_11, window_bounds = array<i64: 512, 2>}]} {
    %c0 = arith.constant 0 : index
    %c0_0 = arith.constant 0 : index
    %0 = vector.load %arg1[%c0, %c0_0] : memref<512x8xf32, #tpu.memory_space<vmem>>, vector<512x8xf32>
    %c0_1 = arith.constant 0 : index
    %c0_2 = arith.constant 0 : index
    %1 = vector.load %arg2[%c0_1, %c0_2] : memref<8x256xf32, #tpu.memory_space<vmem>>, vector<8x256xf32>
    %cst = arith.constant dense<0.000000e+00> : vector<512x256xf32>
    %2 = tpu.matmul %0, %1, %cst {dimension_numbers = #tpu.dot_dimension_numbers<[1], [0], [0], [1], [0, 0, 1, 1], [], []>} : vector<512x8xf32>, vector<8x256xf32>, vector<512x256xf32> -> vector<512x256xf32>
    %c0_3 = arith.constant 0 : index
    %c0_4 = arith.constant 0 : index
    %3 = vector.load %arg3[%c0_3, %c0_4] : memref<1x256xf32, #tpu.memory_space<vmem>>, vector<1x256xf32>
    %4 = vector.broadcast %3 : vector<1x256xf32> to vector<512x256xf32>
    %5 = arith.addf %2, %4 : vector<512x256xf32>
    %cst_5 = arith.constant 0.000000e+00 : f32
    %6 = vector.broadcast %cst_5 : f32 to vector<512x256xf32>
    %7 = arith.maximumf %5, %6 : vector<512x256xf32>
    %8 = vector.extract_strided_slice %7 {offsets = [0, 0], sizes = [512, 128], strides = [1, 1]} : vector<512x256xf32> to vector<512x128xf32>
    %9 = vector.extract_strided_slice %7 {offsets = [0, 128], sizes = [512, 128], strides = [1, 1]} : vector<512x256xf32> to vector<512x128xf32>
    %c0_6 = arith.constant 0 : index
    %c0_7 = arith.constant 0 : index
    %10 = vector.load %arg4[%c0_6, %c0_7] : memref<128x128xf32, #tpu.memory_space<vmem>>, vector<128x128xf32>
    %cst_8 = arith.constant dense<0.000000e+00> : vector<512x128xf32>
    %11 = tpu.matmul %8, %10, %cst_8 {dimension_numbers = #tpu.dot_dimension_numbers<[1], [0], [0], [1], [0, 0, 1, 1], [], []>} : vector<512x128xf32>, vector<128x128xf32>, vector<512x128xf32> -> vector<512x128xf32>
    %c0_9 = arith.constant 0 : index
    %c0_10 = arith.constant 0 : index
    %12 = vector.load %arg5[%c0_9, %c0_10] : memref<1x128xf32, #tpu.memory_space<vmem>>, vector<1x128xf32>
    %13 = vector.broadcast %12 : vector<1x128xf32> to vector<512x128xf32>
    %14 = arith.addf %11, %13 : vector<512x128xf32>
    %c0_11 = arith.constant 0 : index
    %c0_12 = arith.constant 0 : index
    %15 = vector.load %arg6[%c0_11, %c0_12] : memref<128x128xf32, #tpu.memory_space<vmem>>, vector<128x128xf32>
    %cst_13 = arith.constant dense<0.000000e+00> : vector<512x128xf32>
    %16 = tpu.matmul %9, %15, %cst_13 {dimension_numbers = #tpu.dot_dimension_numbers<[1], [0], [0], [1], [0, 0, 1, 1], [], []>} : vector<512x128xf32>, vector<128x128xf32>, vector<512x128xf32> -> vector<512x128xf32>
    %c0_14 = arith.constant 0 : index
    %c0_15 = arith.constant 0 : index
    %17 = vector.load %arg7[%c0_14, %c0_15] : memref<1x128xf32, #tpu.memory_space<vmem>>, vector<1x128xf32>
    %18 = vector.broadcast %17 : vector<1x128xf32> to vector<512x128xf32>
    %19 = arith.addf %16, %18 : vector<512x128xf32>
    %cst_16 = arith.constant 0.000000e+00 : f32
    %20 = vector.broadcast %cst_16 : f32 to vector<512x128xf32>
    %21 = arith.maximumf %19, %20 : vector<512x128xf32>
    %c0_17 = arith.constant 0 : index
    %c0_18 = arith.constant 0 : index
    %22 = vector.load %arg8[%c0_17, %c0_18] : memref<128x128xf32, #tpu.memory_space<vmem>>, vector<128x128xf32>
    %cst_19 = arith.constant dense<0.000000e+00> : vector<512x128xf32>
    %23 = tpu.matmul %21, %22, %cst_19 {dimension_numbers = #tpu.dot_dimension_numbers<[1], [0], [0], [1], [0, 0, 1, 1], [], []>} : vector<512x128xf32>, vector<128x128xf32>, vector<512x128xf32> -> vector<512x128xf32>
    %c0_20 = arith.constant 0 : index
    %c0_21 = arith.constant 0 : index
    %24 = vector.load %arg9[%c0_20, %c0_21] : memref<1x128xf32, #tpu.memory_space<vmem>>, vector<1x128xf32>
    %25 = vector.broadcast %24 : vector<1x128xf32> to vector<512x128xf32>
    %26 = arith.addf %23, %25 : vector<512x128xf32>
    %cst_22 = arith.constant 0.000000e+00 : f32
    %27 = vector.broadcast %cst_22 : f32 to vector<512x128xf32>
    %28 = arith.maximumf %26, %27 : vector<512x128xf32>
    %c0_23 = arith.constant 0 : index
    %c0_24 = arith.constant 0 : index
    %29 = vector.load %arg10[%c0_23, %c0_24] : memref<128x128xf32, #tpu.memory_space<vmem>>, vector<128x128xf32>
    %cst_25 = arith.constant dense<0.000000e+00> : vector<512x128xf32>
    %30 = tpu.matmul %28, %29, %cst_25 {dimension_numbers = #tpu.dot_dimension_numbers<[1], [0], [0], [1], [0, 0, 1, 1], [], []>} : vector<512x128xf32>, vector<128x128xf32>, vector<512x128xf32> -> vector<512x128xf32>
    %c0_26 = arith.constant 0 : index
    %c0_27 = arith.constant 0 : index
    %31 = vector.load %arg11[%c0_26, %c0_27] : memref<1x128xf32, #tpu.memory_space<vmem>>, vector<1x128xf32>
    %32 = vector.broadcast %31 : vector<1x128xf32> to vector<512x128xf32>
    %33 = arith.addf %30, %32 : vector<512x128xf32>
    %34 = arith.addf %14, %33 : vector<512x128xf32>
    %35 = vector.extract_strided_slice %34 {offsets = [0, 0], sizes = [512, 2], strides = [1, 1]} : vector<512x128xf32> to vector<512x2xf32>
    %c0_28 = arith.constant 0 : index
    %c0_29 = arith.constant 0 : index
    %36 = vector.load %arg12[%c0_28, %c0_29] : memref<512x2xf32, #tpu.memory_space<vmem>>, vector<512x2xf32>
    tpu.vector_store %arg12[%c0_28, %c0_29], %35 {strides = array<i32>} : memref<512x2xf32, #tpu.memory_space<vmem>>, vector<512x2xf32>,
    return
  }
  func.func @transform_0(%arg0: i32) -> (i32, i32) {
    %c0_i32 = arith.constant 0 : i32
    %c0_i32_0 = arith.constant 0 : i32
    return %arg0, %c0_i32 : i32, i32
  }
  func.func @transform_1(%arg0: i32) -> (i32, i32) {
    %c0_i32 = arith.constant 0 : i32
    %c0_i32_0 = arith.constant 0 : i32
    %c0_i32_1 = arith.constant 0 : i32
    return %c0_i32, %c0_i32_0 : i32, i32
  }
  func.func @transform_2(%arg0: i32) -> (i32, i32) {
    %c0_i32 = arith.constant 0 : i32
    %c0_i32_0 = arith.constant 0 : i32
    %c0_i32_1 = arith.constant 0 : i32
    return %c0_i32, %c0_i32_0 : i32, i32
  }
  func.func @transform_3(%arg0: i32) -> (i32, i32) {
    %c0_i32 = arith.constant 0 : i32
    %c0_i32_0 = arith.constant 0 : i32
    %c0_i32_1 = arith.constant 0 : i32
    return %c0_i32, %c0_i32_0 : i32, i32
  }
  func.func @transform_4(%arg0: i32) -> (i32, i32) {
    %c0_i32 = arith.constant 0 : i32
    %c0_i32_0 = arith.constant 0 : i32
    %c0_i32_1 = arith.constant 0 : i32
    return %c0_i32, %c0_i32_0 : i32, i32
  }
  func.func @transform_5(%arg0: i32) -> (i32, i32) {
    %c0_i32 = arith.constant 0 : i32
    %c0_i32_0 = arith.constant 0 : i32
    %c0_i32_1 = arith.constant 0 : i32
    return %c0_i32, %c0_i32_0 : i32, i32
  }
  func.func @transform_6(%arg0: i32) -> (i32, i32) {
    %c0_i32 = arith.constant 0 : i32
    %c0_i32_0 = arith.constant 0 : i32
    %c0_i32_1 = arith.constant 0 : i32
    return %c0_i32, %c0_i32_0 : i32, i32
  }
  func.func @transform_7(%arg0: i32) -> (i32, i32) {
    %c0_i32 = arith.constant 0 : i32
    %c0_i32_0 = arith.constant 0 : i32
    %c0_i32_1 = arith.constant 0 : i32
    return %c0_i32, %c0_i32_0 : i32, i32
  }
  func.func @transform_8(%arg0: i32) -> (i32, i32) {
    %c0_i32 = arith.constant 0 : i32
    %c0_i32_0 = arith.constant 0 : i32
    %c0_i32_1 = arith.constant 0 : i32
    return %c0_i32, %c0_i32_0 : i32, i32
  }
  func.func @transform_9(%arg0: i32) -> (i32, i32) {
    %c0_i32 = arith.constant 0 : i32
    %c0_i32_0 = arith.constant 0 : i32
    %c0_i32_1 = arith.constant 0 : i32
    return %c0_i32, %c0_i32_0 : i32, i32
  }
  func.func @transform_10(%arg0: i32) -> (i32, i32) {
    %c0_i32 = arith.constant 0 : i32
    %c0_i32_0 = arith.constant 0 : i32
    %c0_i32_1 = arith.constant 0 : i32
    return %c0_i32, %c0_i32_0 : i32, i32
  }
  func.func @transform_11(%arg0: i32) -> (i32, i32) {
    %c0_i32 = arith.constant 0 : i32
    %c0_i32_0 = arith.constant 0 : i32
    return %arg0, %c0_i32 : i32, i32
  }
}

</mosaic_0001>

<bundles_post_ra>
// kernel: tpu_custom_call.1
= control target key start
LH: loop header
LB: loop body
LE: loop exit
PB: predicated region body
PF: predicated region fallthrough
CT: control target
= control target key end

     0   :  { %v4016_v2 = vmov 0.0   ;;  %vm116_vm0 = vcmask 64512   ;;  %v106_v38 = vlaneseq  ;;  %vm2710_vm1 = vcmask 15360   ;;  %s5408_s1 = inlined_call_operand.vmem [shape: f32[8,256], index: 1, kind: input, shape index: {}]   ;;  %s5409_s0 = inlined_call_operand.vmem [shape: f32[512,8], index: 0, kind: input, shape index: {}]   ;;  %s5410_s3 = inlined_call_operand.vmem [shape: f32[128,128], index: 3, kind: input, shape index: {}]   ;;  %s5411_s2 = inlined_call_operand.vmem [shape: f32[1,256], index: 2, kind: input, shape index: {}]   ;;  %s5412_s5 = inlined_call_operand.vmem [shape: f32[128,128], index: 5, kind: input, shape index: {}]   ;;  %s5413_s7 = inlined_call_operand.vmem [shape: f32[128,128], index: 7, kind: input, shape index: {}]   ;;  %s5414_s9 = inlined_call_operand.vmem [shape: f32[128,128], index: 9, kind: input, shape index: {}]   ;;  %s5415_s6 = inlined_call_operand.vmem [shape: f32[1,128], index: 6, kind: input, shape index: {}]   ;;  %s5416_s8 = inlined_call_operand.vmem [shape: f32[1,128], index: 8, kind: input, shape index: {}]   ;;  %s5417_s4 = inlined_call_operand.vmem [shape: f32[1,128], index: 4, kind: input, shape index: {}]   ;;  %s5418_s10 = inlined_call_operand.vmem [shape: f32[1,128], index: 10, kind: input, shape index: {}]   ;;  %s5419_s11 = inlined_call_operand.vmem [shape: f32[512,2], index: 11, kind: output, shape index: {}]  }
   0x1   :  { %v103_v0 = vld [vmem:[%s5408_s1 + $0x8] sm:$0xff]  ;;  %v102_v1 = vld [vmem:[%s5408_s1] sm:$0xff]  ;;  %373 = vmatprep.mubr.f32.mxu0 %v4016_v2  ;;  %v40_v5 = vld [vmem:[%s5409_s0 + $0x10] sm:$0xff] }
   0x2   :  { %v38_v3 = vld [vmem:[%s5409_s0] sm:$0xff]  ;;  %309 = vmatprep.subr.mxu0 %v103_v0  ;;  %v39_v4 = vld [vmem:[%s5409_s0 + $0x8] sm:$0xff]  ;;  %v41_v6 = vld [vmem:[%s5409_s0 + $0x18] sm:$0xff]  ;;  %v4223_v43 = vshrl.u32 %v106_v38, 7 }
   0x3   :  { %310 = vmatpush1.msra.mxu0 %v102_v1  ;;  %v42_v7 = vld [vmem:[%s5409_s0 + $0x20] sm:$0xff]  ;;  %v43_v8 = vld [vmem:[%s5409_s0 + $0x28] sm:$0xff]  ;;  %v44_v9 = vld [vmem:[%s5409_s0 + $0x30] sm:$0xff] }
   0x4   :  { %2779 = vmatmul.mubr.msk.f32.vlgmr.msra.gmra.mrb[0].mxu0 %vm116_vm0, %v38_v3  ;;  %v45_v10 = vld [vmem:[%s5409_s0 + $0x38] sm:$0xff]  ;;  %v46_v11 = vld [vmem:[%s5409_s0 + $0x40] sm:$0xff]  ;;  %v47_v12 = vld [vmem:[%s5409_s0 + $0x48] sm:$0xff]  ;;  %v112_v46 = vsub.s32 1, %v4223_v43 }
   0x5   :  { %379 = vmatprep.mubr.f32.mxu0 %v4016_v2  ;;  %v48_v13 = vld [vmem:[%s5409_s0 + $0x50] sm:$0xff]  ;;  %v49_v14 = vld [vmem:[%s5409_s0 + $0x58] sm:$0xff]  ;;  %v50_v15 = vld [vmem:[%s5409_s0 + $0x60] sm:$0xff] }
   0x6   :  { %v51_v16 = vld [vmem:[%s5409_s0 + $0x68] sm:$0xff]  ;;  %v52_v17 = vld [vmem:[%s5409_s0 + $0x70] sm:$0xff]  ;;  %v53_v18 = vld [vmem:[%s5409_s0 + $0x78] sm:$0xff] }
   0x7   :  { %v886_v19 = vld [vmem:[%s5410_s3] sm:$0xff]  ;;  %v887_v20 = vld [vmem:[%s5410_s3 + $0x8] sm:$0xff]  ;;  %v888_v23 = vld [vmem:[%s5410_s3 + $0x10] sm:$0xff] }
   0x8   :  { %2780 = vmatmul.mubr.msk.f32.gmra.mrb[2].mxu0 %vm116_vm0, %v39_v4  ;;  %v3679_v21 = vpack.c.bf16 %v887_v20, %v886_v19  ;;  %v54_v22 = vld [vmem:[%s5409_s0 + $0x80] sm:$0xff]  ;;  %v889_v24 = vld [vmem:[%s5410_s3 + $0x18] sm:$0xff]  ;;  %v55_v26 = vld [vmem:[%s5409_s0 + $0x88] sm:$0xff] }
   0x9   :  { %385 = vmatprep.mubr.f32.mxu0 %v4016_v2  ;;  %v3683_v25 = vpack.c.bf16 %v889_v24, %v888_v23  ;;  %v890_v27 = vld [vmem:[%s5410_s3 + $0x20] sm:$0xff]  ;;  %v891_v28 = vld [vmem:[%s5410_s3 + $0x28] sm:$0xff]  ;;  %v56_v30 = vld [vmem:[%s5409_s0 + $0x90] sm:$0xff] }
   0xa   :  { %3680 = vmatprep.subr.bf16.mxu1 %v3679_v21  ;;  %v3687_v29 = vpack.c.bf16 %v891_v28, %v890_v27  ;;  %v892_v31 = vld [vmem:[%s5410_s3 + $0x30] sm:$0xff]  ;;  %v893_v32 = vld [vmem:[%s5410_s3 + $0x38] sm:$0xff]  ;;  %v894_v35 = vld [vmem:[%s5410_s3 + $0x40] sm:$0xff] }
   0xb   :  { %3682 = vmatpush3.bf16.msra.mxu1 %v3679_v21  ;;  %v3691_v33 = vpack.c.bf16 %v893_v32, %v892_v31  ;;  %v57_v34 = vld [vmem:[%s5409_s0 + $0x98] sm:$0xff]  ;;  %v895_v36 = vld [vmem:[%s5410_s3 + $0x48] sm:$0xff]  ;;  %v58_v39 = vld [vmem:[%s5409_s0 + $0xa0] sm:$0xff]  ;;  %v108_v21 = vsub.s32 0, %v4223_v43 }
   0xc   :  { %2781 = vmatmul.mubr.msk.f32.gmra.mrb[4].mxu0 %vm116_vm0, %v40_v5  ;;  %3684 = vmatprep.subr.bf16.mxu1 %v3683_v25  ;;  %v3695_v37 = vpack.c.bf16 %v895_v36, %v894_v35  ;;  %v896_v40 = vld [vmem:[%s5410_s3 + $0x50] sm:$0xff]  ;;  %v897_v41 = vld [vmem:[%s5410_s3 + $0x58] sm:$0xff]  ;;  %v59_v44 = vld [vmem:[%s5409_s0 + $0xa8] sm:$0xff] }
   0xd   :  { %391 = vmatprep.mubr.f32.mxu0 %v4016_v2  ;;  %v3699_v42 = vpack.c.bf16 %v897_v41, %v896_v40  ;;  %v4233_v45 = vld [vmem:[%s5411_s2] sm:$0x3]  ;;  %v899_v48 = vld [vmem:[%s5410_s3 + $0x68] sm:$0xff]  ;;  %v60_v51 = vld [vmem:[%s5409_s0 + $0xb0] sm:$0xff] }
   0xe   :  { %v898_v47 = vld [vmem:[%s5410_s3 + $0x60] sm:$0xff]  ;;  %v4243_v50 = vrot.slane %v4233_v45, %v112_v46  ;;  %v900_v52 = vld [vmem:[%s5410_s3 + $0x70] sm:$0xff]  ;;  %v901_v53 = vld [vmem:[%s5410_s3 + $0x78] sm:$0xff]  ;;  %v4409_v23 = vrot.slane %v4233_v45, %v108_v21 }
   0xf   :  { %3686 = vmatpush3.bf16.msra.mxu1 %v3683_v25  ;;  %v3703_v49 = vpack.c.bf16 %v899_v48, %v898_v47  ;;  %v3707_v54 = vpack.c.bf16 %v901_v53, %v900_v52  ;;  %v61_v55 = vld [vmem:[%s5409_s0 + $0xb8] sm:$0xff]  ;;  %v62_v56 = vld [vmem:[%s5409_s0 + $0xc0] sm:$0xff]  ;;  %v63_v57 = vld [vmem:[%s5409_s0 + $0xc8] sm:$0xff] }
  0x10   :  { %2782 = vmatmul.mubr.msk.f32.gmra.mrb[6].mxu0 %vm116_vm0, %v41_v6  ;;  %3688 = vmatprep.subr.bf16.mxu1 %v3687_v29  ;;  %v64_v58 = vld [vmem:[%s5409_s0 + $0xd0] sm:$0xff]  ;;  %v65_v59 = vld [vmem:[%s5409_s0 + $0xd8] sm:$0xff]  ;;  %v66_v60 = vld [vmem:[%s5409_s0 + $0xe0] sm:$0xff] }
  0x11   :  { %397 = vmatprep.mubr.f32.mxu0 %v4016_v2  ;;  %v67_v61 = vld [vmem:[%s5409_s0 + $0xe8] sm:$0xff]  ;;  %v68_v62 = vld [vmem:[%s5409_s0 + $0xf0] sm:$0xff]  ;;  %v69_v63 = vld [vmem:[%s5409_s0 + $0xf8] sm:$0xff] }
  0x12   :  { %v70_v0 = vld [vmem:[%s5409_s0 + $0x100] sm:$0xff]  ;;  %v71_v1 = vld [vmem:[%s5409_s0 + $0x108] sm:$0xff]  ;;  %v72_v3 = vld [vmem:[%s5409_s0 + $0x110] sm:$0xff] }
  0x13   :  { %3690 = vmatpush3.bf16.msra.mxu1 %v3687_v29  ;;  %v73_v4 = vld [vmem:[%s5409_s0 + $0x118] sm:$0xff]  ;;  %v74_v5 = vld [vmem:[%s5409_s0 + $0x120] sm:$0xff]  ;;  %v75_v6 = vld [vmem:[%s5409_s0 + $0x128] sm:$0xff] }
  0x14   :  { %2783 = vmatmul.mubr.msk.f32.gmra.mrb[8].mxu0 %vm116_vm0, %v42_v7  ;;  %3692 = vmatprep.subr.bf16.mxu1 %v3691_v33  ;;  %v76_v7 = vld [vmem:[%s5409_s0 + $0x130] sm:$0xff]  ;;  %v89_v20 = vld [vmem:[%s5409_s0 + $0x198] sm:$0xff]  ;;  %v91_v24 = vld [vmem:[%s5409_s0 + $0x1a8] sm:$0xff] }
  0x15   :  { %403 = vmatprep.mubr.f32.mxu0 %v4016_v2  ;;  %v88_v19 = vld [vmem:[%s5409_s0 + $0x190] sm:$0xff]  ;;  %v1294_v36 = vld [vmem:[%s5412_s5] sm:$0xff]  ;;  %v95_v46 = vld [vmem:[%s5409_s0 + $0x1c8] sm:$0xff] }
  0x16   :  { %v92_v28 = vld [vmem:[%s5409_s0 + $0x1b0] sm:$0xff]  ;;  %v94_v41 = vld [vmem:[%s5409_s0 + $0x1c0] sm:$0xff] }
  0x17   :  { %3694 = vmatpush3.bf16.msra.mxu1 %v3691_v33  ;;  %v93_v33 = vld [vmem:[%s5409_s0 + $0x1b8] sm:$0xff]  ;;  %v96_v52 = vld [vmem:[%s5409_s0 + $0x1d0] sm:$0xff] }
  0x18   :  { %2784 = vmatmul.mubr.msk.f32.gmra.mrb[10].mxu0 %vm116_vm0, %v43_v8  ;;  %3696 = vmatprep.subr.bf16.mxu1 %v3695_v37  ;;  %v77_v8 = vld [vmem:[%s5409_s0 + $0x138] sm:$0xff] }
  0x19   :  { %409 = vmatprep.mubr.f32.mxu0 %v4016_v2 }
  0x1b   :  { %3698 = vmatpush3.bf16.msra.mxu1 %v3695_v37  ;;  %v1295_v37 = vld [vmem:[%s5412_s5 + $0x8] sm:$0xff] }
  0x1c   :  { %2785 = vmatmul.mubr.msk.f32.gmra.mrb[12].mxu0 %vm116_vm0, %v44_v9  ;;  %3700 = vmatprep.subr.bf16.mxu1 %v3699_v42  ;;  %v78_v9 = vld [vmem:[%s5409_s0 + $0x140] sm:$0xff]  ;;  %v3711_v40 = vpack.c.bf16 %v1295_v37, %v1294_v36 }
  0x1d   :  { %415 = vmatprep.mubr.f32.mxu0 %v4016_v2 }
  0x1f   :  { %3702 = vmatpush3.bf16.msra.mxu1 %v3699_v42 }
  0x20   :  { %2786 = vmatmul.mubr.msk.f32.gmra.mrb[14].mxu0 %vm116_vm0, %v45_v10  ;;  %3704 = vmatprep.subr.bf16.mxu1 %v3703_v49  ;;  %v79_v10 = vld [vmem:[%s5409_s0 + $0x148] sm:$0xff] }
  0x21   :  { %421 = vmatprep.mubr.f32.mxu0 %v4016_v2 }
  0x23   :  { %3706 = vmatpush3.bf16.msra.mxu1 %v3703_v49 }
  0x24   :  { %2787 = vmatmul.mubr.msk.f32.gmra.mrb[16].mxu0 %vm116_vm0, %v46_v11  ;;  %3708 = vmatprep.subr.bf16.mxu1 %v3707_v54  ;;  %v80_v11 = vld [vmem:[%s5409_s0 + $0x150] sm:$0xff] }
  0x25   :  { %427 = vmatprep.mubr.f32.mxu0 %v4016_v2 }
  0x27   :  { %3710 = vmatpush3.bf16.msra.mxu1 %v3707_v54 }
  0x28   :  { %2788 = vmatmul.mubr.msk.f32.gmra.mrb[18].mxu0 %vm116_vm0, %v47_v12  ;;  %v81_v12 = vld [vmem:[%s5409_s0 + $0x158] sm:$0xff]  ;;  %3712 = vmatprep.subr.bf16.mxu1 %v3711_v40 }
  0x29   :  { %433 = vmatprep.mubr.f32.mxu0 %v4016_v2 }
  0x2c   :  { %2789 = vmatmul.mubr.msk.f32.gmra.mrb[20].mxu0 %vm116_vm0, %v48_v13  ;;  %v82_v13 = vld [vmem:[%s5409_s0 + $0x160] sm:$0xff] }
  0x2d   :  { %439 = vmatprep.mubr.f32.mxu0 %v4016_v2 }
  0x30   :  { %2790 = vmatmul.mubr.msk.f32.gmra.mrb[22].mxu0 %vm116_vm0, %v49_v14  ;;  %v83_v14 = vld [vmem:[%s5409_s0 + $0x168] sm:$0xff] }
  0x31   :  { %445 = vmatprep.mubr.f32.mxu0 %v4016_v2 }
  0x34   :  { %2791 = vmatmul.mubr.msk.f32.gmra.mrb[24].mxu0 %vm116_vm0, %v50_v15  ;;  %v84_v15 = vld [vmem:[%s5409_s0 + $0x170] sm:$0xff] }
  0x35   :  { %451 = vmatprep.mubr.f32.mxu0 %v4016_v2 }
  0x38   :  { %2792 = vmatmul.mubr.msk.f32.gmra.mrb[26].mxu0 %vm116_vm0, %v51_v16  ;;  %v85_v16 = vld [vmem:[%s5409_s0 + $0x178] sm:$0xff] }
  0x39   :  { %457 = vmatprep.mubr.f32.mxu0 %v4016_v2 }
  0x3c   :  { %2793 = vmatmul.mubr.msk.f32.gmra.mrb[28].mxu0 %vm116_vm0, %v52_v17  ;;  %v86_v17 = vld [vmem:[%s5409_s0 + $0x180] sm:$0xff] }
  0x3d   :  { %463 = vmatprep.mubr.f32.mxu0 %v4016_v2 }
  0x40   :  { %2794 = vmatmul.mubr.msk.f32.gmra.mrb[30].mxu0 %vm116_vm0, %v53_v18  ;;  %v87_v18 = vld [vmem:[%s5409_s0 + $0x188] sm:$0xff] }
  0x41   :  { %469 = vmatprep.mubr.f32.mxu0 %v4016_v2 }
  0x44   :  { %2795 = vmatmul.mubr.msk.f32.gmra.mrb[32].mxu0 %vm116_vm0, %v54_v22  ;;  %v90_v22 = vld [vmem:[%s5409_s0 + $0x1a0] sm:$0xff] }
  0x45   :  { %475 = vmatprep.mubr.f32.mxu0 %v4016_v2 }
  0x48   :  { %2796 = vmatmul.mubr.msk.f32.gmra.mrb[34].mxu0 %vm116_vm0, %v55_v26 }
  0x49   :  { %481 = vmatprep.mubr.f32.mxu0 %v4016_v2 }
  0x4c   :  { %2797 = vmatmul.mubr.msk.f32.gmra.mrb[36].mxu0 %vm116_vm0, %v56_v30 }
  0x4d   :  { %487 = vmatprep.mubr.f32.mxu0 %v4016_v2 }
  0x50   :  { %2798 = vmatmul.mubr.msk.f32.gmra.mrb[38].mxu0 %vm116_vm0, %v57_v34 }
  0x51   :  { %493 = vmatprep.mubr.f32.mxu0 %v4016_v2 }
  0x54   :  { %2799 = vmatmul.mubr.msk.f32.gmra.mrb[40].mxu0 %vm116_vm0, %v58_v39 }
  0x55   :  { %499 = vmatprep.mubr.f32.mxu0 %v4016_v2 }
  0x58   :  { %2800 = vmatmul.mubr.msk.f32.gmra.mrb[42].mxu0 %vm116_vm0, %v59_v44 }
  0x59   :  { %505 = vmatprep.mubr.f32.mxu0 %v4016_v2 }
  0x5c   :  { %2801 = vmatmul.mubr.msk.f32.gmra.mrb[44].mxu0 %vm116_vm0, %v60_v51 }
  0x5d   :  { %511 = vmatprep.mubr.f32.mxu0 %v4016_v2 }
  0x60   :  { %2802 = vmatmul.mubr.msk.f32.gmra.mrb[46].mxu0 %vm116_vm0, %v61_v55 }
  0x61   :  { %517 = vmatprep.mubr.f32.mxu0 %v4016_v2 }
  0x64   :  { %2803 = vmatmul.mubr.msk.f32.gmra.mrb[48].mxu0 %vm116_vm0, %v62_v56 }
  0x65   :  { %523 = vmatprep.mubr.f32.mxu0 %v4016_v2 }
  0x68   :  { %2804 = vmatmul.mubr.msk.f32.gmra.mrb[50].mxu0 %vm116_vm0, %v63_v57  ;;  %v97_v57 = vld [vmem:[%s5409_s0 + $0x1d8] sm:$0xff] }
  0x69   :  { %529 = vmatprep.mubr.f32.mxu0 %v4016_v2 }
  0x6c   :  { %2805 = vmatmul.mubr.msk.f32.gmra.mrb[52].mxu0 %vm116_vm0, %v64_v58 }
  0x6d   :  { %535 = vmatprep.mubr.f32.mxu0 %v4016_v2 }
  0x70   :  { %2806 = vmatmul.mubr.msk.f32.gmra.mrb[54].mxu0 %vm116_vm0, %v65_v59  ;;  %v1296_v59 = vld [vmem:[%s5412_s5 + $0x10] sm:$0xff] }
  0x71   :  { %541 = vmatprep.mubr.f32.mxu0 %v4016_v2 }
  0x74   :  { %2807 = vmatmul.mubr.msk.f32.gmra.mrb[56].mxu0 %vm116_vm0, %v66_v60  ;;  %v1297_v60 = vld [vmem:[%s5412_s5 + $0x18] sm:$0xff] }
  0x75   :  { %547 = vmatprep.mubr.f32.mxu0 %v4016_v2 }
  0x78   :  { %2808 = vmatmul.mubr.msk.f32.gmra.mrb[58].mxu0 %vm116_vm0, %v67_v61 }
  0x79   :  { %553 = vmatprep.mubr.f32.mxu0 %v4016_v2 }
  0x7c   :  { %2809 = vmatmul.mubr.msk.f32.gmra.mrb[60].mxu0 %vm116_vm0, %v68_v62  ;;  %v3715_v62 = vpack.c.bf16 %v1297_v60, %v1296_v59 }
  0x7d   :  { %559 = vmatprep.mubr.f32.mxu0 %v4016_v2 }
  0x80   :  { %2810 = vmatmul.mubr.msk.f32.gmra.mrb[62].mxu0 %vm116_vm0, %v69_v63 }
  0x81   :  { %565 = vmatprep.mubr.f32.mxu0 %v4016_v2 }
  0x84   :  { %2811 = vmatmul.mubr.msk.f32.gmra.mrb[64].mxu0 %vm116_vm0, %v70_v0 }
  0x85   :  { %571 = vmatprep.mubr.f32.mxu0 %v4016_v2 }
  0x88   :  { %2812 = vmatmul.mubr.msk.f32.gmra.mrb[66].mxu0 %vm116_vm0, %v71_v1  ;;  %v98_v1 = vld [vmem:[%s5409_s0 + $0x1e0] sm:$0xff] }
  0x89   :  { %577 = vmatprep.mubr.f32.mxu0 %v4016_v2 }
  0x8c   :  { %2813 = vmatmul.mubr.msk.f32.gmra.mrb[68].mxu0 %vm116_vm0, %v72_v3 }
  0x8d   :  { %583 = vmatprep.mubr.f32.mxu0 %v4016_v2 }
  0x90   :  { %2814 = vmatmul.mubr.msk.f32.gmra.mrb[70].mxu0 %vm116_vm0, %v73_v4 }
  0x91   :  { %589 = vmatprep.mubr.f32.mxu0 %v4016_v2 }
  0x94   :  { %2815 = vmatmul.mubr.msk.f32.gmra.mrb[72].mxu0 %vm116_vm0, %v74_v5 }
  0x95   :  { %595 = vmatprep.mubr.f32.mxu0 %v4016_v2 }
  0x98   :  { %2816 = vmatmul.mubr.msk.f32.gmra.mrb[74].mxu0 %vm116_vm0, %v75_v6 }
  0x99   :  { %601 = vmatprep.mubr.f32.mxu0 %v4016_v2 }
  0x9c   :  { %2817 = vmatmul.mubr.msk.f32.gmra.mrb[76].mxu0 %vm116_vm0, %v76_v7  ;;  %v99_v7 = vld [vmem:[%s5409_s0 + $0x1e8] sm:$0xff] }
  0x9d   :  { %607 = vmatprep.mubr.f32.mxu0 %v4016_v2 }
  0xa0   :  { %2818 = vmatmul.mubr.msk.f32.gmra.mrb[78].mxu0 %vm116_vm0, %v77_v8 }
  0xa1   :  { %613 = vmatprep.mubr.f32.mxu0 %v4016_v2 }
  0xa4   :  { %2819 = vmatmul.mubr.msk.f32.gmra.mrb[80].mxu0 %vm116_vm0, %v78_v9 }
  0xa5   :  { %619 = vmatprep.mubr.f32.mxu0 %v4016_v2 }
  0xa8   :  { %2820 = vmatmul.mubr.msk.f32.gmra.mrb[82].mxu0 %vm116_vm0, %v79_v10 }
  0xa9   :  { %625 = vmatprep.mubr.f32.mxu0 %v4016_v2 }
  0xac   :  { %2821 = vmatmul.mubr.msk.f32.gmra.mrb[84].mxu0 %vm116_vm0, %v80_v11 }
  0xad   :  { %631 = vmatprep.mubr.f32.mxu0 %v4016_v2 }
  0xb0   :  { %2822 = vmatmul.mubr.msk.f32.gmra.mrb[86].mxu0 %vm116_vm0, %v81_v12  ;;  %v100_v12 = vld [vmem:[%s5409_s0 + $0x1f0] sm:$0xff] }
  0xb1   :  { %637 = vmatprep.mubr.f32.mxu0 %v4016_v2 }
  0xb4   :  { %2823 = vmatmul.mubr.msk.f32.gmra.mrb[88].mxu0 %vm116_vm0, %v82_v13 }
  0xb5   :  { %643 = vmatprep.mubr.f32.mxu0 %v4016_v2 }
  0xb8   :  { %2824 = vmatmul.mubr.msk.f32.gmra.mrb[90].mxu0 %vm116_vm0, %v83_v14 }
  0xb9   :  { %649 = vmatprep.mubr.f32.mxu0 %v4016_v2 }
  0xbc   :  { %2825 = vmatmul.mubr.msk.f32.gmra.mrb[92].mxu0 %vm116_vm0, %v84_v15 }
  0xbd   :  { %655 = vmatprep.mubr.f32.mxu0 %v4016_v2 }
  0xc0   :  { %2826 = vmatmul.mubr.msk.f32.gmra.mrb[94].mxu0 %vm116_vm0, %v85_v16 }
  0xc1   :  { %661 = vmatprep.mubr.f32.mxu0 %v4016_v2 }
  0xc4   :  { %2827 = vmatmul.mubr.msk.f32.gmra.mrb[96].mxu0 %vm116_vm0, %v86_v17  ;;  %v101_v17 = vld [vmem:[%s5409_s0 + $0x1f8] sm:$0xff] }
  0xc5   :  { %667 = vmatprep.mubr.f32.mxu0 %v4016_v2 }
  0xc8   :  { %2828 = vmatmul.mubr.msk.f32.gmra.mrb[98].mxu0 %vm116_vm0, %v87_v18 }
  0xc9   :  { %673 = vmatprep.mubr.f32.mxu0 %v4016_v2 }
  0xcc   :  { %2829 = vmatmul.mubr.msk.f32.gmra.mrb[100].mxu0 %vm116_vm0, %v88_v19  ;;  %v1298_v19 = vld [vmem:[%s5412_s5 + $0x20] sm:$0xff] }
  0xcd   :  { %679 = vmatprep.mubr.f32.mxu0 %v4016_v2 }
  0xd0   :  { %2830 = vmatmul.mubr.msk.f32.gmra.mrb[102].mxu0 %vm116_vm0, %v89_v20  ;;  %v1299_v20 = vld [vmem:[%s5412_s5 + $0x28] sm:$0xff] }
  0xd1   :  { %685 = vmatprep.mubr.f32.mxu0 %v4016_v2 }
  0xd4   :  { %2831 = vmatmul.mubr.msk.f32.gmra.mrb[104].mxu0 %vm116_vm0, %v90_v22  ;;  %v3719_v22 = vpack.c.bf16 %v1299_v20, %v1298_v19 }
  0xd5   :  { %691 = vmatprep.mubr.f32.mxu0 %v4016_v2 }
  0xd7   :  { %v375_v25 = vpop.f32.mrb[0].mxu0 }
  0xd8   :  { %v4415_v26 = vpop.f32.mrb[1].mxu0  ;;  %2832 = vmatmul.mubr.msk.f32.gmra.mrb[106].mxu0 %vm116_vm0, %v91_v24  ;;  %v376_v27 = vadd.f32 %v375_v25, %v4409_v23 }
  0xd9   :  { %697 = vmatprep.mubr.f32.mxu0 %v4016_v2 }
  0xda   :  { %v758_v29 = vmax.f32 %v376_v27, 0.0 }
  0xdb   :  { %v381_v30 = vpop.f32.mrb[2].mxu0 }
  0xdc   :  { %v382_v31 = vadd.f32 %v381_v30, %v4409_v23  ;;  %v4424_v32 = vpop.f32.mrb[3].mxu0  ;;  %2833 = vmatmul.mubr.msk.f32.gmra.mrb[108].mxu0 %vm116_vm0, %v92_v28  ;;  %3199 = vmatprep.mubr.f32.mxu1 %v758_v29 }
  0xdd   :  { %703 = vmatprep.mubr.f32.mxu0 %v4016_v2 }
  0xde   :  { %v760_v34 = vmax.f32 %v382_v31, 0.0 }
  0xdf   :  { %v387_v35 = vpop.f32.mrb[4].mxu0 }
  0xe0   :  { %v388_v38 = vadd.f32 %v387_v35, %v4409_v23  ;;  %v4438_v39 = vpop.f32.mrb[5].mxu0  ;;  %2834 = vmatmul.mubr.msk.f32.gmra.mrb[110].mxu0 %vm116_vm0, %v93_v33  ;;  %3200 = vmatmul.mubr.f32.vlgmr.msra.gmra.mrb[0].mxu1 %v760_v34 }
  0xe1   :  { %709 = vmatprep.mubr.f32.mxu0 %v4016_v2  ;;  %3714 = vmatpush3.bf16.msra.mxu1 %v3711_v40 }
  0xe2   :  { %v762_v42 = vmax.f32 %v388_v38, 0.0  ;;  %3716 = vmatprep.subr.bf16.mxu1 %v3715_v62 }
  0xe3   :  { %v393_v43 = vpop.f32.mrb[6].mxu0 }
  0xe4   :  { %v394_v44 = vadd.f32 %v393_v43, %v4409_v23  ;;  %v4446_v45 = vpop.f32.mrb[7].mxu0  ;;  %2835 = vmatmul.mubr.msk.f32.gmra.mrb[112].mxu0 %vm116_vm0, %v94_v41  ;;  %3202 = vmatprep.mubr.f32.mxu1 %v762_v42  ;;  %v1300_v41 = vld [vmem:[%s5412_s5 + $0x30] sm:$0xff]  ;;  %v1301_v42 = vld [vmem:[%s5412_s5 + $0x38] sm:$0xff] }
  0xe5   :  { %715 = vmatprep.mubr.f32.mxu0 %v4016_v2  ;;  %3718 = vmatpush3.bf16.msra.mxu1 %v3715_v62 }
  0xe6   :  { %v764_v47 = vmax.f32 %v394_v44, 0.0  ;;  %3720 = vmatprep.subr.bf16.mxu1 %v3719_v22  ;;  %v3723_v44 = vpack.c.bf16 %v1301_v42, %v1300_v41 }
  0xe7   :  { %v399_v48 = vpop.f32.mrb[8].mxu0 }
  0xe8   :  { %v400_v49 = vadd.f32 %v399_v48, %v4409_v23  ;;  %v4454_v51 = vpop.f32.mrb[9].mxu0  ;;  %2836 = vmatmul.mubr.msk.f32.gmra.mrb[114].mxu0 %vm116_vm0, %v95_v46  ;;  %3203 = vmatmul.mubr.f32.gmra.mrb[2].mxu1 %v764_v47 }
  0xe9   :  { %721 = vmatprep.mubr.f32.mxu0 %v4016_v2  ;;  %3722 = vmatpush3.bf16.msra.mxu1 %v3719_v22 }
  0xea   :  { %v766_v53 = vmax.f32 %v400_v49, 0.0  ;;  %3724 = vmatprep.subr.bf16.mxu1 %v3723_v44 }
  0xeb   :  { %v405_v54 = vpop.f32.mrb[10].mxu0 }
  0xec   :  { %v406_v55 = vadd.f32 %v405_v54, %v4409_v23  ;;  %v4462_v56 = vpop.f32.mrb[11].mxu0  ;;  %2837 = vmatmul.mubr.msk.f32.gmra.mrb[116].mxu0 %vm116_vm0, %v96_v52  ;;  %3205 = vmatprep.mubr.f32.mxu1 %v766_v53 }
  0xed   :  { %727 = vmatprep.mubr.f32.mxu0 %v4016_v2  ;;  %3726 = vmatpush3.bf16.msra.mxu1 %v3723_v44 }
  0xee   :  { %v768_v58 = vmax.f32 %v406_v55, 0.0 }
  0xef   :  { %v411_v61 = vpop.f32.mrb[12].mxu0 }
  0xf0   :  { %v412_v63 = vadd.f32 %v411_v61, %v4409_v23  ;;  %v4476_v0 = vpop.f32.mrb[13].mxu0  ;;  %2838 = vmatmul.mubr.msk.f32.gmra.mrb[118].mxu0 %vm116_vm0, %v97_v57  ;;  %3206 = vmatmul.mubr.f32.gmra.mrb[4].mxu1 %v768_v58 }
  0xf1   :  { %733 = vmatprep.mubr.f32.mxu0 %v4016_v2 }
  0xf2   :  { %v770_v3 = vmax.f32 %v412_v63, 0.0 }
  0xf3   :  { %v417_v4 = vpop.f32.mrb[14].mxu0 }
  0xf4   :  { %v418_v5 = vadd.f32 %v417_v4, %v4409_v23  ;;  %v4484_v6 = vpop.f32.mrb[15].mxu0  ;;  %2839 = vmatmul.mubr.msk.f32.gmra.mrb[120].mxu0 %vm116_vm0, %v98_v1  ;;  %3208 = vmatprep.mubr.f32.mxu1 %v770_v3  ;;  %v1302_v1 = vld [vmem:[%s5412_s5 + $0x40] sm:$0xff]  ;;  %v1303_v3 = vld [vmem:[%s5412_s5 + $0x48] sm:$0xff] }
  0xf5   :  { %739 = vmatprep.mubr.f32.mxu0 %v4016_v2 }
  0xf6   :  { %v772_v8 = vmax.f32 %v418_v5, 0.0  ;;  %v3727_v5 = vpack.c.bf16 %v1303_v3, %v1302_v1 }
  0xf7   :  { %v423_v9 = vpop.f32.mrb[16].mxu0 }
  0xf8   :  { %v424_v10 = vadd.f32 %v423_v9, %v4409_v23  ;;  %v4492_v11 = vpop.f32.mrb[17].mxu0  ;;  %2840 = vmatmul.mubr.msk.f32.gmra.mrb[122].mxu0 %vm116_vm0, %v99_v7  ;;  %3209 = vmatmul.mubr.f32.gmra.mrb[6].mxu1 %v772_v8 }
  0xf9   :  { %745 = vmatprep.mubr.f32.mxu0 %v4016_v2  ;;  %3728 = vmatprep.subr.bf16.mxu1 %v3727_v5 }
  0xfa   :  { %v774_v13 = vmax.f32 %v424_v10, 0.0  ;;  %3730 = vmatpush3.bf16.msra.mxu1 %v3727_v5 }
  0xfb   :  { %v429_v14 = vpop.f32.mrb[18].mxu0 }
  0xfc   :  { %v430_v15 = vadd.f32 %v429_v14, %v4409_v23  ;;  %v4500_v16 = vpop.f32.mrb[19].mxu0  ;;  %2841 = vmatmul.mubr.msk.f32.gmra.mrb[124].mxu0 %vm116_vm0, %v100_v12  ;;  %3211 = vmatprep.mubr.f32.mxu1 %v774_v13 }
  0xfd   :  { %751 = vmatprep.mubr.f32.mxu0 %v4016_v2 }
  0xfe   :  { %v776_v18 = vmax.f32 %v430_v15, 0.0 }
  0xff   :  { %v435_v21 = vpop.f32.mrb[20].mxu0 }
 0x100   :  { %v436_v24 = vadd.f32 %v435_v21, %v4409_v23  ;;  %v4514_v25 = vpop.f32.mrb[21].mxu0  ;;  %2842 = vmatmul.mubr.msk.f32.gmra.mrb[126].mxu0 %vm116_vm0, %v101_v17  ;;  %3212 = vmatmul.mubr.f32.gmra.mrb[8].mxu1 %v776_v18 }
 0x102   :  { %v778_v2 = vmax.f32 %v436_v24, 0.0 }
 0x103   :  { %v441_v27 = vpop.f32.mrb[22].mxu0 }
 0x104   :  { %v442_v28 = vadd.f32 %v441_v27, %v4409_v23  ;;  %v4518_v29 = vpop.f32.mrb[23].mxu0  ;;  %3214 = vmatprep.mubr.f32.mxu1 %v778_v2  ;;  %v1304_v2 = vld [vmem:[%s5412_s5 + $0x50] sm:$0xff]  ;;  %v1305_v27 = vld [vmem:[%s5412_s5 + $0x58] sm:$0xff] }
 0x106   :  { %v780_v30 = vmax.f32 %v442_v28, 0.0 }
 0x107   :  { %v447_v31 = vpop.f32.mrb[24].mxu0 }
 0x108   :  { %v448_v33 = vadd.f32 %v447_v31, %v4409_v23  ;;  %v4521_v34 = vpop.f32.mrb[25].mxu0  ;;  %3215 = vmatmul.mubr.f32.gmra.mrb[10].mxu1 %v780_v30  ;;  %v3731_v30 = vpack.c.bf16 %v1305_v27, %v1304_v2  ;;  %v1308_v27 = vld [vmem:[%s5412_s5 + $0x70] sm:$0xff] }
 0x10a   :  { %v782_v35 = vmax.f32 %v448_v33, 0.0  ;;  %3732 = vmatprep.subr.bf16.mxu1 %v3731_v30 }
 0x10b   :  { %v453_v36 = vpop.f32.mrb[26].mxu0  ;;  %3734 = vmatpush3.bf16.msra.mxu1 %v3731_v30 }
 0x10c   :  { %v454_v37 = vadd.f32 %v453_v36, %v4409_v23  ;;  %v4524_v38 = vpop.f32.mrb[27].mxu0  ;;  %3217 = vmatprep.mubr.f32.mxu1 %v782_v35 }
 0x10e   :  { %v784_v40 = vmax.f32 %v454_v37, 0.0 }
 0x10f   :  { %v459_v43 = vpop.f32.mrb[28].mxu0 }
 0x110   :  { %v460_v46 = vadd.f32 %v459_v43, %v4409_v23  ;;  %v4533_v47 = vpop.f32.mrb[29].mxu0  ;;  %3218 = vmatmul.mubr.f32.gmra.mrb[12].mxu1 %v784_v40 }
 0x112   :  { %v786_v48 = vmax.f32 %v460_v46, 0.0  ;;  %v1766_v46 = vld [vmem:[%s5413_s7] sm:$0xff] }
 0x113   :  { %v465_v49 = vpop.f32.mrb[30].mxu0 }
 0x114   :  { %v466_v52 = vadd.f32 %v465_v49, %v4409_v23  ;;  %v4536_v53 = vpop.f32.mrb[31].mxu0  ;;  %3220 = vmatprep.mubr.f32.mxu1 %v786_v48  ;;  %v1767_v48 = vld [vmem:[%s5413_s7 + $0x8] sm:$0xff] }
 0x115   :  { %v3743_v49 = vpack.c.bf16 %v1767_v48, %v1766_v46 }
 0x116   :  { %v788_v54 = vmax.f32 %v466_v52, 0.0 }
 0x117   :  { %v471_v55 = vpop.f32.mrb[32].mxu0  ;;  %3744 = vmatprep.subr.bf16.mxu0 %v3743_v49 }
 0x118   :  { %v472_v57 = vadd.f32 %v471_v55, %v4409_v23  ;;  %v4539_v58 = vpop.f32.mrb[33].mxu0  ;;  %3221 = vmatmul.mubr.f32.gmra.mrb[14].mxu1 %v788_v54  ;;  %3746 = vmatpush3.bf16.msra.mxu0 %v3743_v49  ;;  %v1768_v49 = vld [vmem:[%s5413_s7 + $0x10] sm:$0xff] }
 0x11a   :  { %v790_v59 = vmax.f32 %v472_v57, 0.0 }
 0x11b   :  { %v477_v60 = vpop.f32.mrb[34].mxu0 }
 0x11c   :  { %v478_v61 = vadd.f32 %v477_v60, %v4409_v23  ;;  %v4542_v62 = vpop.f32.mrb[35].mxu0  ;;  %3223 = vmatprep.mubr.f32.mxu1 %v790_v59  ;;  %v1306_v60 = vld [vmem:[%s5412_s5 + $0x60] sm:$0xff] }
 0x11e   :  { %v792_v63 = vmax.f32 %v478_v61, 0.0  ;;  %v1307_v61 = vld [vmem:[%s5412_s5 + $0x68] sm:$0xff] }
 0x11f   :  { %v483_v4 = vpop.f32.mrb[36].mxu0  ;;  %v3735_v1 = vpack.c.bf16 %v1307_v61, %v1306_v60 }
 0x120   :  { %v484_v7 = vadd.f32 %v483_v4, %v4409_v23  ;;  %v4551_v8 = vpop.f32.mrb[37].mxu0  ;;  %3224 = vmatmul.mubr.f32.gmra.mrb[16].mxu1 %v792_v63 }
 0x121   :  { %3736 = vmatprep.subr.bf16.mxu1 %v3735_v1 }
 0x122   :  { %v794_v9 = vmax.f32 %v484_v7, 0.0  ;;  %3738 = vmatpush3.bf16.msra.mxu1 %v3735_v1 }
 0x123   :  { %v489_v10 = vpop.f32.mrb[38].mxu0 }
 0x124   :  { %v490_v12 = vadd.f32 %v489_v10, %v4409_v23  ;;  %v4554_v13 = vpop.f32.mrb[39].mxu0  ;;  %3226 = vmatprep.mubr.f32.mxu1 %v794_v9 }
 0x126   :  { %v796_v14 = vmax.f32 %v490_v12, 0.0 }
 0x127   :  { %v495_v15 = vpop.f32.mrb[40].mxu0 }
 0x128   :  { %v496_v17 = vadd.f32 %v495_v15, %v4409_v23  ;;  %v4557_v18 = vpop.f32.mrb[41].mxu0  ;;  %3227 = vmatmul.mubr.f32.gmra.mrb[18].mxu1 %v796_v14 }
 0x12a   :  { %v798_v19 = vmax.f32 %v496_v17, 0.0 }
 0x12b   :  { %v501_v20 = vpop.f32.mrb[42].mxu0 }
 0x12c   :  { %v502_v21 = vadd.f32 %v501_v20, %v4409_v23  ;;  %v4560_v22 = vpop.f32.mrb[43].mxu0  ;;  %3229 = vmatprep.mubr.f32.mxu1 %v798_v19 }
 0x12e   :  { %v800_v24 = vmax.f32 %v502_v21, 0.0 }
 0x12f   :  { %v507_v28 = vpop.f32.mrb[44].mxu0 }
 0x130   :  { %v508_v31 = vadd.f32 %v507_v28, %v4409_v23  ;;  %v4569_v33 = vpop.f32.mrb[45].mxu0  ;;  %3230 = vmatmul.mubr.f32.gmra.mrb[20].mxu1 %v800_v24  ;;  %v1309_v28 = vld [vmem:[%s5412_s5 + $0x78] sm:$0xff] }
 0x132   :  { %v802_v35 = vmax.f32 %v508_v31, 0.0  ;;  %v3739_v31 = vpack.c.bf16 %v1309_v28, %v1308_v27 }
 0x133   :  { %v513_v36 = vpop.f32.mrb[46].mxu0 }
 0x134   :  { %v514_v37 = vadd.f32 %v513_v36, %v4409_v23  ;;  %v4572_v40 = vpop.f32.mrb[47].mxu0  ;;  %3232 = vmatprep.mubr.f32.mxu1 %v802_v35  ;;  %3740 = vmatprep.subr.bf16.mxu1 %v3739_v31 }
 0x135   :  { %3742 = vmatpush3.bf16.msra.mxu1 %v3739_v31 }
 0x136   :  { %v804_v41 = vmax.f32 %v514_v37, 0.0 }
 0x137   :  { %v519_v42 = vpop.f32.mrb[48].mxu0 }
 0x138   :  { %v520_v43 = vadd.f32 %v519_v42, %v4409_v23  ;;  %v4575_v44 = vpop.f32.mrb[49].mxu0  ;;  %3233 = vmatmul.mubr.f32.gmra.mrb[22].mxu1 %v804_v41 }
 0x13a   :  { %v806_v52 = vmax.f32 %v520_v43, 0.0 }
 0x13b   :  { %v525_v54 = vpop.f32.mrb[50].mxu0 }
 0x13c   :  { %v526_v55 = vadd.f32 %v525_v54, %v4409_v23  ;;  %v4584_v57 = vpop.f32.mrb[51].mxu0  ;;  %3235 = vmatprep.mubr.f32.mxu1 %v806_v52  ;;  %v1769_v52 = vld [vmem:[%s5413_s7 + $0x18] sm:$0xff] }
 0x13e   :  { %v808_v59 = vmax.f32 %v526_v55, 0.0 }
 0x13f   :  { %v531_v63 = vpop.f32.mrb[52].mxu0 }
 0x140   :  { %v532_v3 = vadd.f32 %v531_v63, %v4409_v23  ;;  %v4593_v4 = vpop.f32.mrb[53].mxu0  ;;  %3236 = vmatmul.mubr.f32.gmra.mrb[24].mxu1 %v808_v59  ;;  %v3747_v59 = vpack.c.bf16 %v1769_v52, %v1768_v49 }
 0x142   :  { %v810_v5 = vmax.f32 %v532_v3, 0.0  ;;  %3748 = vmatprep.subr.bf16.mxu0 %v3747_v59 }
 0x143   :  { %v537_v7 = vpop.f32.mrb[54].mxu0  ;;  %3750 = vmatpush3.bf16.msra.mxu0 %v3747_v59  ;;  %v1770_v59 = vld [vmem:[%s5413_s7 + $0x20] sm:$0xff] }
 0x144   :  { %v538_v9 = vadd.f32 %v537_v7, %v4409_v23  ;;  %v4596_v10 = vpop.f32.mrb[55].mxu0  ;;  %3238 = vmatprep.mubr.f32.mxu1 %v810_v5 }
 0x146   :  { %v812_v12 = vmax.f32 %v538_v9, 0.0 }
 0x147   :  { %v543_v14 = vpop.f32.mrb[56].mxu0 }
 0x148   :  { %v544_v15 = vadd.f32 %v543_v14, %v4409_v23  ;;  %v4599_v17 = vpop.f32.mrb[57].mxu0  ;;  %3239 = vmatmul.mubr.f32.gmra.mrb[26].mxu1 %v812_v12 }
 0x14a   :  { %v814_v19 = vmax.f32 %v544_v15, 0.0 }
 0x14b   :  { %v549_v20 = vpop.f32.mrb[58].mxu0 }
 0x14c   :  { %v550_v21 = vadd.f32 %v549_v20, %v4409_v23  ;;  %v4602_v24 = vpop.f32.mrb[59].mxu0  ;;  %3241 = vmatprep.mubr.f32.mxu1 %v814_v19 }
 0x14e   :  { %v816_v2 = vmax.f32 %v550_v21, 0.0 }
 0x14f   :  { %v555_v30 = vpop.f32.mrb[60].mxu0 }
 0x150   :  { %v556_v35 = vadd.f32 %v555_v30, %v4409_v23  ;;  %v4611_v36 = vpop.f32.mrb[61].mxu0  ;;  %3242 = vmatmul.mubr.f32.gmra.mrb[28].mxu1 %v816_v2 }
 0x152   :  { %v818_v37 = vmax.f32 %v556_v35, 0.0 }
 0x153   :  { %v561_v41 = vpop.f32.mrb[62].mxu0 }
 0x154   :  { %v562_v42 = vadd.f32 %v561_v41, %v4409_v23  ;;  %v4614_v43 = vpop.f32.mrb[63].mxu0  ;;  %3244 = vmatprep.mubr.f32.mxu1 %v818_v37 }
 0x156   :  { %v820_v46 = vmax.f32 %v562_v42, 0.0 }
 0x157   :  { %v567_v48 = vpop.f32.mrb[64].mxu0 }
 0x158   :  { %v568_v54 = vadd.f32 %v567_v48, %v4409_v23  ;;  %v4623_v55 = vpop.f32.mrb[65].mxu0  ;;  %3245 = vmatmul.mubr.f32.gmra.mrb[30].mxu1 %v820_v46 }
 0x15a   :  { %v822_v60 = vmax.f32 %v568_v54, 0.0 }
 0x15b   :  { %v573_v61 = vpop.f32.mrb[66].mxu0 }
 0x15c   :  { %v574_v63 = vadd.f32 %v573_v61, %v4409_v23  ;;  %v4626_v1 = vpop.f32.mrb[67].mxu0  ;;  %3247 = vmatprep.mubr.f32.mxu1 %v822_v60  ;;  %v1771_v60 = vld [vmem:[%s5413_s7 + $0x28] sm:$0xff] }
 0x15e   :  { %v824_v3 = vmax.f32 %v574_v63, 0.0  ;;  %v3751_v63 = vpack.c.bf16 %v1771_v60, %v1770_v59 }
 0x15f   :  { %v579_v5 = vpop.f32.mrb[68].mxu0 }
 0x160   :  { %v580_v7 = vadd.f32 %v579_v5, %v4409_v23  ;;  %v4629_v9 = vpop.f32.mrb[69].mxu0  ;;  %3248 = vmatmul.mubr.f32.gmra.mrb[32].mxu1 %v824_v3  ;;  %3752 = vmatprep.subr.bf16.mxu0 %v3751_v63 }
 0x161   :  { %3754 = vmatpush3.bf16.msra.mxu0 %v3751_v63 }
 0x162   :  { %v826_v12 = vmax.f32 %v580_v7, 0.0 }
 0x163   :  { %v585_v14 = vpop.f32.mrb[70].mxu0 }
 0x164   :  { %v586_v15 = vadd.f32 %v585_v14, %v4409_v23  ;;  %v4632_v19 = vpop.f32.mrb[71].mxu0  ;;  %3250 = vmatprep.mubr.f32.mxu1 %v826_v12 }
 0x166   :  { %v828_v20 = vmax.f32 %v586_v15, 0.0 }
 0x167   :  { %v591_v21 = vpop.f32.mrb[72].mxu0 }
 0x168   :  { %v592_v2 = vadd.f32 %v591_v21, %v4409_v23  ;;  %v4635_v27 = vpop.f32.mrb[73].mxu0  ;;  %3251 = vmatmul.mubr.f32.gmra.mrb[34].mxu1 %v828_v20 }
 0x16a   :  { %v830_v28 = vmax.f32 %v592_v2, 0.0 }
 0x16b   :  { %v597_v30 = vpop.f32.mrb[74].mxu0 }
 0x16c   :  { %v598_v31 = vadd.f32 %v597_v30, %v4409_v23  ;;  %v4638_v35 = vpop.f32.mrb[75].mxu0  ;;  %3253 = vmatprep.mubr.f32.mxu1 %v830_v28 }
 0x16e   :  { %v832_v37 = vmax.f32 %v598_v31, 0.0 }
 0x16f   :  { %v603_v41 = vpop.f32.mrb[76].mxu0 }
 0x170   :  { %v604_v42 = vadd.f32 %v603_v41, %v4409_v23  ;;  %v4641_v46 = vpop.f32.mrb[77].mxu0  ;;  %3254 = vmatmul.mubr.f32.gmra.mrb[36].mxu1 %v832_v37 }
 0x172   :  { %v834_v48 = vmax.f32 %v604_v42, 0.0 }
 0x173   :  { %v609_v49 = vpop.f32.mrb[78].mxu0 }
 0x174   :  { %v610_v52 = vadd.f32 %v609_v49, %v4409_v23  ;;  %v4644_v54 = vpop.f32.mrb[79].mxu0  ;;  %3256 = vmatprep.mubr.f32.mxu1 %v834_v48 }
 0x176   :  { %v836_v61 = vmax.f32 %v610_v52, 0.0 }
 0x177   :  { %v615_v3 = vpop.f32.mrb[80].mxu0 }
 0x178   :  { %v616_v5 = vadd.f32 %v615_v3, %v4409_v23  ;;  %v4653_v7 = vpop.f32.mrb[81].mxu0  ;;  %3257 = vmatmul.mubr.f32.gmra.mrb[38].mxu1 %v836_v61 }
 0x17a   :  { %v838_v12 = vmax.f32 %v616_v5, 0.0 }
 0x17b   :  { %v621_v14 = vpop.f32.mrb[82].mxu0 }
 0x17c   :  { %v622_v15 = vadd.f32 %v621_v14, %v4409_v23  ;;  %v4656_v20 = vpop.f32.mrb[83].mxu0  ;;  %3259 = vmatprep.mubr.f32.mxu1 %v838_v12 }
 0x17e   :  { %v840_v21 = vmax.f32 %v622_v15, 0.0 }
 0x17f   :  { %v627_v2 = vpop.f32.mrb[84].mxu0 }
 0x180   :  { %v628_v28 = vadd.f32 %v627_v2, %v4409_v23  ;;  %v4659_v30 = vpop.f32.mrb[85].mxu0  ;;  %3260 = vmatmul.mubr.f32.gmra.mrb[40].mxu1 %v840_v21 }
 0x182   :  { %v842_v31 = vmax.f32 %v628_v28, 0.0 }
 0x183   :  { %v633_v37 = vpop.f32.mrb[86].mxu0 }
 0x184   :  { %v634_v41 = vadd.f32 %v633_v37, %v4409_v23  ;;  %v4662_v42 = vpop.f32.mrb[87].mxu0  ;;  %3262 = vmatprep.mubr.f32.mxu1 %v842_v31  ;;  %v1772_v37 = vld [vmem:[%s5413_s7 + $0x30] sm:$0xff] }
 0x186   :  { %v844_v48 = vmax.f32 %v634_v41, 0.0  ;;  %v1773_v41 = vld [vmem:[%s5413_s7 + $0x38] sm:$0xff] }
 0x187   :  { %v639_v49 = vpop.f32.mrb[88].mxu0 }
 0x188   :  { %v640_v52 = vadd.f32 %v639_v49, %v4409_v23  ;;  %v4665_v59 = vpop.f32.mrb[89].mxu0  ;;  %3263 = vmatmul.mubr.f32.gmra.mrb[42].mxu1 %v844_v48  ;;  %v3755_v49 = vpack.c.bf16 %v1773_v41, %v1772_v37 }
 0x18a   :  { %v846_v60 = vmax.f32 %v640_v52, 0.0  ;;  %3756 = vmatprep.subr.bf16.mxu0 %v3755_v49 }
 0x18b   :  { %v645_v61 = vpop.f32.mrb[90].mxu0  ;;  %3758 = vmatpush3.bf16.msra.mxu0 %v3755_v49 }
 0x18c   :  { %v646_v63 = vadd.f32 %v645_v61, %v4409_v23  ;;  %v4668_v3 = vpop.f32.mrb[91].mxu0  ;;  %3265 = vmatprep.mubr.f32.mxu1 %v846_v60 }
 0x18e   :  { %v848_v5 = vmax.f32 %v646_v63, 0.0 }
 0x18f   :  { %v651_v12 = vpop.f32.mrb[92].mxu0 }
 0x190   :  { %v652_v14 = vadd.f32 %v651_v12, %v4409_v23  ;;  %v4671_v15 = vpop.f32.mrb[93].mxu0  ;;  %3266 = vmatmul.mubr.f32.gmra.mrb[44].mxu1 %v848_v5 }
 0x192   :  { %v850_v21 = vmax.f32 %v652_v14, 0.0 }
 0x193   :  { %v657_v2 = vpop.f32.mrb[94].mxu0 }
 0x194   :  { %v658_v28 = vadd.f32 %v657_v2, %v4409_v23  ;;  %v4674_v31 = vpop.f32.mrb[95].mxu0  ;;  %3268 = vmatprep.mubr.f32.mxu1 %v850_v21 }
 0x196   :  { %v852_v48 = vmax.f32 %v658_v28, 0.0 }
 0x197   :  { %v663_v52 = vpop.f32.mrb[96].mxu0 }
 0x198   :  { %v664_v60 = vadd.f32 %v663_v52, %v4409_v23  ;;  %v4683_v61 = vpop.f32.mrb[97].mxu0  ;;  %3269 = vmatmul.mubr.f32.gmra.mrb[46].mxu1 %v852_v48 }
 0x199   :  { %5420 = vst [vmem:[#allocation2_spill] sm:$0xff] %v4683_v61 }
 0x19a   :  { %v854_v63 = vmax.f32 %v664_v60, 0.0 }
 0x19b   :  { %v669_v5 = vpop.f32.mrb[98].mxu0 }
 0x19c   :  { %v670_v12 = vadd.f32 %v669_v5, %v4409_v23  ;;  %v4686_v14 = vpop.f32.mrb[99].mxu0  ;;  %3271 = vmatprep.mubr.f32.mxu1 %v854_v63 }
 0x19d   :  { %5421 = vst [vmem:[#allocation3_spill] sm:$0xff] %v4686_v14 }
 0x19e   :  { %v856_v21 = vmax.f32 %v670_v12, 0.0 }
 0x19f   :  { %v675_v2 = vpop.f32.mrb[100].mxu0 }
 0x1a0   :  { %v676_v28 = vadd.f32 %v675_v2, %v4409_v23  ;;  %v4689_v37 = vpop.f32.mrb[101].mxu0  ;;  %3272 = vmatmul.mubr.f32.gmra.mrb[48].mxu1 %v856_v21 }
 0x1a1   :  { %5422 = vst [vmem:[#allocation4_spill] sm:$0xff] %v4689_v37 }
 0x1a2   :  { %v858_v41 = vmax.f32 %v676_v28, 0.0 }
 0x1a3   :  { %v681_v52 = vpop.f32.mrb[102].mxu0 }
 0x1a4   :  { %v682_v48 = vadd.f32 %v681_v52, %v4409_v23  ;;  %v4692_v61 = vpop.f32.mrb[103].mxu0  ;;  %3274 = vmatprep.mubr.f32.mxu1 %v858_v41 }
 0x1a5   :  { %5423 = vst [vmem:[#allocation5_spill] sm:$0xff] %v4692_v61 }
 0x1a6   :  { %v860_v49 = vmax.f32 %v682_v48, 0.0 }
 0x1a7   :  { %v687_v60 = vpop.f32.mrb[104].mxu0 }
 0x1a8   :  { %v688_v5 = vadd.f32 %v687_v60, %v4409_v23  ;;  %v4695_v14 = vpop.f32.mrb[105].mxu0  ;;  %3275 = vmatmul.mubr.f32.gmra.mrb[50].mxu1 %v860_v49 }
 0x1a9   :  { %5424 = vst [vmem:[#allocation6_spill] sm:$0xff] %v4695_v14 }
 0x1aa   :  { %v862_v63 = vmax.f32 %v688_v5, 0.0 }
 0x1ab   :  { %v693_v12 = vpop.f32.mrb[106].mxu0 }
 0x1ac   :  { %v694_v2 = vadd.f32 %v693_v12, %v4409_v23  ;;  %v4698_v37 = vpop.f32.mrb[107].mxu0  ;;  %3277 = vmatprep.mubr.f32.mxu1 %v862_v63  ;;  %v1774_v63 = vld [vmem:[%s5413_s7 + $0x40] sm:$0xff]  ;;  %v1775_v12 = vld [vmem:[%s5413_s7 + $0x48] sm:$0xff] }
 0x1ad   :  { %5425 = vst [vmem:[#allocation7_spill] sm:$0xff] %v4698_v37 }
 0x1ae   :  { %v864_v21 = vmax.f32 %v694_v2, 0.0 }
 0x1af   :  { %v699_v28 = vpop.f32.mrb[108].mxu0 }
 0x1b0   :  { %v700_v52 = vadd.f32 %v699_v28, %v4409_v23  ;;  %v4701_v61 = vpop.f32.mrb[109].mxu0  ;;  %3278 = vmatmul.mubr.f32.gmra.mrb[52].mxu1 %v864_v21  ;;  %v3759_v21 = vpack.c.bf16 %v1775_v12, %v1774_v63 }
 0x1b1   :  { %5426 = vst [vmem:[#allocation8_spill] sm:$0xff] %v4701_v61 }
 0x1b2   :  { %v866_v41 = vmax.f32 %v700_v52, 0.0  ;;  %3760 = vmatprep.subr.bf16.mxu0 %v3759_v21 }
 0x1b3   :  { %v705_v48 = vpop.f32.mrb[110].mxu0  ;;  %v4703_v60 = vpop.f32.mrb[0].mxu1  ;;  %3762 = vmatpush3.bf16.msra.mxu0 %v3759_v21 }
 0x1b4   :  { %5427 = vst [vmem:[#allocation9_spill] sm:$0xff] %v4703_v60  ;;  %v706_v49 = vadd.f32 %v705_v48, %v4409_v23  ;;  %v4706_v5 = vpop.f32.mrb[111].mxu0  ;;  %v4708_v14 = vpop.f32.mrb[1].mxu1  ;;  %3280 = vmatprep.mubr.f32.mxu1 %v866_v41 }
 0x1b5   :  { %5428 = vst [vmem:[#allocation10_spill] sm:$0xff] %v4706_v5  ;;  %5429 = vst [vmem:[#allocation11_spill] sm:$0xff] %v4708_v14 }
 0x1b6   :  { %v868_v2 = vmax.f32 %v706_v49, 0.0 }
 0x1b7   :  { %v711_v28 = vpop.f32.mrb[112].mxu0 }
 0x1b8   :  { %v712_v52 = vadd.f32 %v711_v28, %v4409_v23  ;;  %v4717_v60 = vpop.f32.mrb[113].mxu0  ;;  %3281 = vmatmul.mubr.f32.gmra.mrb[54].mxu1 %v868_v2 }
 0x1b9   :  { %5430 = vst [vmem:[#allocation12_spill] sm:$0xff] %v4717_v60 }
 0x1ba   :  { %v870_v48 = vmax.f32 %v712_v52, 0.0 }
 0x1bb   :  { %v717_v41 = vpop.f32.mrb[114].mxu0  ;;  %v4719_v14 = vpop.f32.mrb[2].mxu1 }
 0x1bc   :  { %5431 = vst [vmem:[#allocation13_spill] sm:$0xff] %v4719_v14  ;;  %v718_v5 = vadd.f32 %v717_v41, %v4409_v23  ;;  %v4722_v61 = vpop.f32.mrb[115].mxu0  ;;  %v4724_v37 = vpop.f32.mrb[3].mxu1  ;;  %3283 = vmatprep.mubr.f32.mxu1 %v870_v48 }
 0x1bd   :  { %5432 = vst [vmem:[#allocation14_spill] sm:$0xff] %v4722_v61  ;;  %5433 = vst [vmem:[#allocation15_spill] sm:$0xff] %v4724_v37 }
 0x1be   :  { %v872_v49 = vmax.f32 %v718_v5, 0.0 }
 0x1bf   :  { %v723_v63 = vpop.f32.mrb[116].mxu0 }
 0x1c0   :  { %v724_v12 = vadd.f32 %v723_v63, %v4409_v23  ;;  %v4727_v28 = vpop.f32.mrb[117].mxu0  ;;  %3284 = vmatmul.mubr.f32.gmra.mrb[56].mxu1 %v872_v49 }
 0x1c1   :  { %5434 = vst [vmem:[#allocation16_spill] sm:$0xff] %v4727_v28 }
 0x1c2   :  { %v874_v2 = vmax.f32 %v724_v12, 0.0 }
 0x1c3   :  { %v729_v21 = vpop.f32.mrb[118].mxu0  ;;  %v4729_v52 = vpop.f32.mrb[4].mxu1 }
 0x1c4   :  { %5435 = vst [vmem:[#allocation17_spill] sm:$0xff] %v4729_v52  ;;  %v730_v14 = vadd.f32 %v729_v21, %v4409_v23  ;;  %v4732_v60 = vpop.f32.mrb[119].mxu0  ;;  %v4734_v41 = vpop.f32.mrb[5].mxu1  ;;  %3286 = vmatprep.mubr.f32.mxu1 %v874_v2  ;;  %v378_v2 = vadd.f32 %v4415_v26, %v4243_v50 }
 0x1c5   :  { %5436 = vst [vmem:[#allocation18_spill] sm:$0xff] %v4732_v60  ;;  %5437 = vst [vmem:[#allocation19_spill] sm:$0xff] %v4734_v41 }
 0x1c6   :  { %v876_v37 = vmax.f32 %v730_v14, 0.0  ;;  %v759_v26 = vmax.f32 %v378_v2, 0.0 }
 0x1c7   :  { %v735_v48 = vpop.f32.mrb[120].mxu0 }
 0x1c8   :  { %v736_v5 = vadd.f32 %v735_v48, %v4409_v23  ;;  %v4737_v61 = vpop.f32.mrb[121].mxu0  ;;  %3287 = vmatmul.mubr.f32.gmra.mrb[58].mxu1 %v876_v37 }
 0x1ca   :  { %v878_v63 = vmax.f32 %v736_v5, 0.0 }
 0x1cb   :  { %v741_v49 = vpop.f32.mrb[122].mxu0 }
 0x1cc   :  { %v742_v12 = vadd.f32 %v741_v49, %v4409_v23  ;;  %v4740_v28 = vpop.f32.mrb[123].mxu0  ;;  %3289 = vmatprep.mubr.f32.mxu1 %v878_v63  ;;  %v1776_v63 = vld [vmem:[%s5413_s7 + $0x50] sm:$0xff] }
 0x1ce   :  { %v880_v21 = vmax.f32 %v742_v12, 0.0 }
 0x1cf   :  { %v747_v52 = vpop.f32.mrb[124].mxu0 }
 0x1d0   :  { %v748_v60 = vadd.f32 %v747_v52, %v4409_v23  ;;  %v4743_v41 = vpop.f32.mrb[125].mxu0  ;;  %3290 = vmatmul.mubr.f32.gmra.mrb[60].mxu1 %v880_v21  ;;  %v1777_v52 = vld [vmem:[%s5413_s7 + $0x58] sm:$0xff]  ;;  %v1778_v21 = vld [vmem:[%s5413_s7 + $0x60] sm:$0xff] }
 0x1d1   :  { %v3763_v12 = vpack.c.bf16 %v1777_v52, %v1776_v63 }
 0x1d2   :  { %v882_v14 = vmax.f32 %v748_v60, 0.0  ;;  %v384_v60 = vadd.f32 %v4424_v32, %v4243_v50  ;;  %v1780_v32 = vld [vmem:[%s5413_s7 + $0x70] sm:$0xff] }
 0x1d3   :  { %v753_v48 = vpop.f32.mrb[126].mxu0  ;;  %3764 = vmatprep.subr.bf16.mxu0 %v3763_v12 }
 0x1d4   :  { %v754_v37 = vadd.f32 %v753_v48, %v4409_v23  ;;  %v4748_v5 = vpop.f32.mrb[127].mxu0  ;;  %3292 = vmatprep.mubr.f32.mxu1 %v882_v14  ;;  %v390_v23 = vadd.f32 %v4438_v39, %v4243_v50  ;;  %v1779_v14 = vld [vmem:[%s5413_s7 + $0x68] sm:$0xff]  ;;  %3766 = vmatpush3.bf16.msra.mxu0 %v3763_v12  ;;  %v1781_v39 = vld [vmem:[%s5413_s7 + $0x78] sm:$0xff]  ;;  %v761_v48 = vmax.f32 %v384_v60, 0.0  ;;  %v408_v12 = vadd.f32 %v4462_v56, %v4243_v50 }
 0x1d5   :  { %v3767_v2 = vpack.c.bf16 %v1779_v14, %v1778_v21  ;;  %v3771_v63 = vpack.c.bf16 %v1781_v39, %v1780_v32  ;;  %v414_v60 = vadd.f32 %v4476_v0, %v4243_v50  ;;  %v426_v14 = vadd.f32 %v4492_v11, %v4243_v50 }
 0x1d6   :  { %v884_v49 = vmax.f32 %v754_v37, 0.0  ;;  %v396_v37 = vadd.f32 %v4446_v45, %v4243_v50  ;;  %v763_v52 = vmax.f32 %v390_v23, 0.0  ;;  %v769_v45 = vmax.f32 %v408_v12, 0.0 }
 0x1d7   :  { %3768 = vmatprep.subr.bf16.mxu0 %v3767_v2  ;;  %v771_v23 = vmax.f32 %v414_v60, 0.0  ;;  %v432_v56 = vadd.f32 %v4500_v16, %v4243_v50  ;;  %v438_v0 = vadd.f32 %v4514_v25, %v4243_v50  ;;  %v450_v11 = vadd.f32 %v4521_v34, %v4243_v50 }
 0x1d8   :  { %3293 = vmatmul.mubr.f32.gmra.mrb[62].mxu1 %v884_v49  ;;  %v402_v49 = vadd.f32 %v4454_v51, %v4243_v50  ;;  %3770 = vmatpush3.bf16.msra.mxu0 %v3767_v2  ;;  %v420_v51 = vadd.f32 %v4484_v6, %v4243_v50  ;;  %v775_v2 = vmax.f32 %v426_v14, 0.0  ;;  %v444_v6 = vadd.f32 %v4518_v29, %v4243_v50 }
 0x1d9   :  { %3327 = vmatprep.mubr.f32.mxu1 %v759_v26  ;;  %v765_v26 = vmax.f32 %v396_v37, 0.0  ;;  %3772 = vmatprep.subr.bf16.mxu0 %v3771_v63  ;;  %v777_v39 = vmax.f32 %v432_v56, 0.0  ;;  %v456_v16 = vadd.f32 %v4524_v38, %v4243_v50  ;;  %v462_v25 = vadd.f32 %v4533_v47, %v4243_v50 }
 0x1da   :  { %v767_v21 = vmax.f32 %v402_v49, 0.0  ;;  %v773_v32 = vmax.f32 %v420_v51, 0.0  ;;  %v781_v37 = vmax.f32 %v444_v6, 0.0  ;;  %v468_v29 = vadd.f32 %v4536_v53, %v4243_v50 }
 0x1db   :  { %v787_v49 = vmax.f32 %v462_v25, 0.0  ;;  %v474_v34 = vadd.f32 %v4539_v58, %v4243_v50  ;;  %v480_v38 = vadd.f32 %v4542_v62, %v4243_v50  ;;  %v486_v47 = vadd.f32 %v4551_v8, %v4243_v50 }
 0x1dc   :  { %3328 = vmatmul.mubr.f32.vlgmr.msra.gmra.mrb[64].mxu1 %v761_v48  ;;  %3774 = vmatpush3.bf16.msra.mxu0 %v3771_v63  ;;  %v779_v48 = vmax.f32 %v438_v0, 0.0  ;;  %v783_v63 = vmax.f32 %v450_v11, 0.0  ;;  %v492_v53 = vadd.f32 %v4554_v13, %v4243_v50  ;;  %v498_v58 = vadd.f32 %v4557_v18, %v4243_v50 }
 0x1dd   :  { %3330 = vmatprep.mubr.f32.mxu1 %v763_v52  ;;  %v785_v52 = vmax.f32 %v456_v16, 0.0  ;;  %v791_v12 = vmax.f32 %v474_v34, 0.0  ;;  %v795_v60 = vmax.f32 %v486_v47, 0.0  ;;  %v504_v62 = vadd.f32 %v4560_v22, %v4243_v50 }
 0x1de   :  { %v799_v51 = vmax.f32 %v498_v58, 0.0  ;;  %v510_v8 = vadd.f32 %v4569_v33, %v4243_v50  ;;  %v516_v13 = vadd.f32 %v4572_v40, %v4243_v50  ;;  %v522_v18 = vadd.f32 %v4575_v44, %v4243_v50 }
 0x1df   :  { %v528_v22 = vadd.f32 %v4584_v57, %v4243_v50  ;;  %v534_v33 = vadd.f32 %v4593_v4, %v4243_v50  ;;  %v540_v40 = vadd.f32 %v4596_v10, %v4243_v50  ;;  %v546_v44 = vadd.f32 %v4599_v17, %v4243_v50 }
 0x1e0   :  { %3331 = vmatmul.mubr.f32.gmra.mrb[66].mxu1 %v765_v26  ;;  %v789_v26 = vmax.f32 %v468_v29, 0.0  ;;  %v803_v14 = vmax.f32 %v510_v8, 0.0  ;;  %v807_v56 = vmax.f32 %v522_v18, 0.0  ;;  %v552_v57 = vadd.f32 %v4602_v24, %v4243_v50 }
 0x1e1   :  { %3333 = vmatprep.mubr.f32.mxu1 %v767_v21  ;;  %v793_v21 = vmax.f32 %v480_v38, 0.0  ;;  %v811_v0 = vmax.f32 %v534_v33, 0.0  ;;  %v815_v6 = vmax.f32 %v546_v44, 0.0  ;;  %v558_v4 = vadd.f32 %v4611_v36, %v4243_v50  ;;  %v5443_v33 = vld [vmem:[#allocation7_spill] sm:$0xff] }
 0x1e2   :  { %v564_v10 = vadd.f32 %v4614_v43, %v4243_v50  ;;  %v570_v17 = vadd.f32 %v4623_v55, %v4243_v50  ;;  %v576_v24 = vadd.f32 %v4626_v1, %v4243_v50  ;;  %v582_v36 = vadd.f32 %v4629_v9, %v4243_v50 }
 0x1e3   :  { %v819_v11 = vmax.f32 %v558_v4, 0.0  ;;  %v588_v43 = vadd.f32 %v4632_v19, %v4243_v50  ;;  %v594_v55 = vadd.f32 %v4635_v27, %v4243_v50  ;;  %v600_v1 = vadd.f32 %v4638_v35, %v4243_v50 }
 0x1e4   :  { %3334 = vmatmul.mubr.f32.gmra.mrb[68].mxu1 %v769_v45  ;;  %v797_v45 = vmax.f32 %v492_v53, 0.0  ;;  %v823_v16 = vmax.f32 %v570_v17, 0.0  ;;  %v827_v25 = vmax.f32 %v582_v36, 0.0  ;;  %v606_v9 = vadd.f32 %v4641_v46, %v4243_v50  ;;  %v5447_v17 = vld [vmem:[#allocation14_spill] sm:$0xff] }
 0x1e5   :  { %3336 = vmatprep.mubr.f32.mxu1 %v771_v23  ;;  %v801_v23 = vmax.f32 %v504_v62, 0.0  ;;  %v831_v29 = vmax.f32 %v594_v55, 0.0  ;;  %v612_v19 = vadd.f32 %v4644_v54, %v4243_v50  ;;  %v618_v27 = vadd.f32 %v4653_v7, %v4243_v50 }
 0x1e6   :  { %v835_v34 = vmax.f32 %v606_v9, 0.0  ;;  %v624_v35 = vadd.f32 %v4656_v20, %v4243_v50  ;;  %v630_v46 = vadd.f32 %v4659_v30, %v4243_v50  ;;  %v636_v54 = vadd.f32 %v4662_v42, %v4243_v50 }
 0x1e7   :  { %v839_v38 = vmax.f32 %v618_v27, 0.0  ;;  %v642_v7 = vadd.f32 %v4665_v59, %v4243_v50  ;;  %v648_v20 = vadd.f32 %v4668_v3, %v4243_v50  ;;  %v654_v30 = vadd.f32 %v4671_v15, %v4243_v50 }
 0x1e8   :  { %3337 = vmatmul.mubr.f32.gmra.mrb[70].mxu1 %v773_v32  ;;  %v805_v32 = vmax.f32 %v516_v13, 0.0  ;;  %v843_v47 = vmax.f32 %v630_v46, 0.0  ;;  %v660_v42 = vadd.f32 %v4674_v31, %v4243_v50 }
 0x1e9   :  { %3339 = vmatprep.mubr.f32.mxu1 %v775_v2  ;;  %v809_v2 = vmax.f32 %v528_v22, 0.0  ;;  %v847_v53 = vmax.f32 %v642_v7, 0.0  ;;  %v851_v58 = vmax.f32 %v654_v30, 0.0  ;;  %v2242_v7 = vld [vmem:[%s5414_s9 + $0x20] sm:$0xff] }
 0x1ea   :  { %v853_v62 = vmax.f32 %v660_v42, 0.0  ;;  %v2245_v42 = vld [vmem:[%s5414_s9 + $0x38] sm:$0xff] }
 0x1ec   :  { %3340 = vmatmul.mubr.f32.gmra.mrb[72].mxu1 %v777_v39  ;;  %v813_v39 = vmax.f32 %v540_v40, 0.0 }
 0x1ed   :  { %3342 = vmatprep.mubr.f32.mxu1 %v779_v48  ;;  %v817_v48 = vmax.f32 %v552_v57, 0.0  ;;  %v5445_v57 = vld [vmem:[#allocation10_spill] sm:$0xff] }
 0x1f0   :  { %3343 = vmatmul.mubr.f32.gmra.mrb[74].mxu1 %v781_v37  ;;  %v821_v37 = vmax.f32 %v564_v10, 0.0 }
 0x1f1   :  { %3345 = vmatprep.mubr.f32.mxu1 %v783_v63  ;;  %v825_v63 = vmax.f32 %v576_v24, 0.0 }
 0x1f4   :  { %3346 = vmatmul.mubr.f32.gmra.mrb[76].mxu1 %v785_v52  ;;  %v829_v52 = vmax.f32 %v588_v43, 0.0  ;;  %v5449_v43 = vld [vmem:[#allocation18_spill] sm:$0xff] }
 0x1f5   :  { %3348 = vmatprep.mubr.f32.mxu1 %v787_v49  ;;  %v833_v49 = vmax.f32 %v600_v1, 0.0 }
 0x1f8   :  { %3349 = vmatmul.mubr.f32.gmra.mrb[78].mxu1 %v789_v26  ;;  %v837_v26 = vmax.f32 %v612_v19, 0.0 }
 0x1f9   :  { %3351 = vmatprep.mubr.f32.mxu1 %v791_v12  ;;  %v841_v12 = vmax.f32 %v624_v35, 0.0  ;;  %v2241_v35 = vld [vmem:[%s5414_s9 + $0x18] sm:$0xff] }
 0x1fc   :  { %3352 = vmatmul.mubr.f32.gmra.mrb[80].mxu1 %v793_v21  ;;  %v845_v21 = vmax.f32 %v636_v54, 0.0 }
 0x1fd   :  { %3354 = vmatprep.mubr.f32.mxu1 %v795_v60  ;;  %v849_v60 = vmax.f32 %v648_v20, 0.0  ;;  %v2244_v20 = vld [vmem:[%s5414_s9 + $0x30] sm:$0xff] }
 0x200   :  { %3355 = vmatmul.mubr.f32.gmra.mrb[82].mxu1 %v797_v45  ;;  %v5438_v45 = vld [vmem:[#allocation2_spill] sm:$0xff] }
 0x201   :  { %3357 = vmatprep.mubr.f32.mxu1 %v799_v51  ;;  %v666_v59 = vadd.f32 %v5438_v45, %v4243_v50  ;;  %v5439_v51 = vld [vmem:[#allocation3_spill] sm:$0xff] }
 0x202   :  { %v672_v3 = vadd.f32 %v5439_v51, %v4243_v50  ;;  %v3787_v51 = vpack.c.bf16 %v2245_v42, %v2244_v20 }
 0x203   :  { %v855_v8 = vmax.f32 %v666_v59, 0.0 }
 0x204   :  { %3358 = vmatmul.mubr.f32.gmra.mrb[84].mxu1 %v801_v23  ;;  %v5440_v23 = vld [vmem:[#allocation4_spill] sm:$0xff]  ;;  %v857_v13 = vmax.f32 %v672_v3, 0.0  ;;  %v2246_v3 = vld [vmem:[%s5414_s9 + $0x40] sm:$0xff] }
 0x205   :  { %3360 = vmatprep.mubr.f32.mxu1 %v803_v14  ;;  %v678_v15 = vadd.f32 %v5440_v23, %v4243_v50  ;;  %v5441_v14 = vld [vmem:[#allocation5_spill] sm:$0xff] }
 0x206   :  { %v684_v31 = vadd.f32 %v5441_v14, %v4243_v50 }
 0x207   :  { %v859_v18 = vmax.f32 %v678_v15, 0.0 }
 0x208   :  { %3361 = vmatmul.mubr.f32.gmra.mrb[86].mxu1 %v805_v32  ;;  %v5442_v32 = vld [vmem:[#allocation6_spill] sm:$0xff] }
 0x209   :  { %3363 = vmatprep.mubr.f32.mxu1 %v807_v56  ;;  %v690_v22 = vadd.f32 %v5442_v32, %v4243_v50  ;;  %v861_v56 = vmax.f32 %v684_v31, 0.0 }
 0x20b   :  { %v863_v40 = vmax.f32 %v690_v22, 0.0  ;;  %v2248_v22 = vld [vmem:[%s5414_s9 + $0x50] sm:$0xff] }
 0x20c   :  { %3364 = vmatmul.mubr.f32.gmra.mrb[88].mxu1 %v809_v2  ;;  %v696_v2 = vadd.f32 %v5443_v33, %v4243_v50 }
 0x20d   :  { %3366 = vmatprep.mubr.f32.mxu1 %v811_v0  ;;  %v5444_v0 = vld [vmem:[#allocation8_spill] sm:$0xff] }
 0x20e   :  { %v702_v44 = vadd.f32 %v5444_v0, %v4243_v50 }
 0x210   :  { %3367 = vmatmul.mubr.f32.gmra.mrb[90].mxu1 %v813_v39  ;;  %v865_v39 = vmax.f32 %v696_v2, 0.0  ;;  %v867_v4 = vmax.f32 %v702_v44, 0.0 }
 0x211   :  { %3369 = vmatprep.mubr.f32.mxu1 %v815_v6  ;;  %v708_v6 = vadd.f32 %v5445_v57, %v4243_v50 }
 0x214   :  { %3370 = vmatmul.mubr.f32.gmra.mrb[92].mxu1 %v817_v48  ;;  %v5446_v48 = vld [vmem:[#allocation12_spill] sm:$0xff] }
 0x215   :  { %3372 = vmatprep.mubr.f32.mxu1 %v819_v11  ;;  %v714_v10 = vadd.f32 %v5446_v48, %v4243_v50  ;;  %v869_v11 = vmax.f32 %v708_v6, 0.0  ;;  %v2250_v6 = vld [vmem:[%s5414_s9 + $0x60] sm:$0xff] }
 0x217   :  { %v871_v24 = vmax.f32 %v714_v10, 0.0 }
 0x218   :  { %3373 = vmatmul.mubr.f32.gmra.mrb[94].mxu1 %v821_v37  ;;  %v720_v37 = vadd.f32 %v5447_v17, %v4243_v50 }
 0x219   :  { %3375 = vmatprep.mubr.f32.mxu1 %v823_v16  ;;  %v5448_v16 = vld [vmem:[#allocation16_spill] sm:$0xff] }
 0x21a   :  { %v726_v36 = vadd.f32 %v5448_v16, %v4243_v50 }
 0x21c   :  { %3376 = vmatmul.mubr.f32.gmra.mrb[96].mxu1 %v825_v63  ;;  %v873_v63 = vmax.f32 %v720_v37, 0.0  ;;  %v875_v55 = vmax.f32 %v726_v36, 0.0 }
 0x21d   :  { %3378 = vmatprep.mubr.f32.mxu1 %v827_v25  ;;  %v732_v25 = vadd.f32 %v5449_v43, %v4243_v50 }
 0x21f   :  { %v877_v1 = vmax.f32 %v732_v25, 0.0 }
 0x220   :  { %3379 = vmatmul.mubr.f32.gmra.mrb[98].mxu1 %v829_v52  ;;  %v738_v52 = vadd.f32 %v4737_v61, %v4243_v50 }
 0x221   :  { %3381 = vmatprep.mubr.f32.mxu1 %v831_v29  ;;  %v744_v29 = vadd.f32 %v4740_v28, %v4243_v50  ;;  %v2239_v28 = vld [vmem:[%s5414_s9 + $0x8] sm:$0xff] }
 0x222   :  { %v879_v9 = vmax.f32 %v738_v52, 0.0 }
 0x223   :  { %v881_v19 = vmax.f32 %v744_v29, 0.0 }
 0x224   :  { %3382 = vmatmul.mubr.f32.gmra.mrb[100].mxu1 %v833_v49  ;;  %v750_v49 = vadd.f32 %v4743_v41, %v4243_v50 }
 0x225   :  { %3384 = vmatprep.mubr.f32.mxu1 %v835_v34  ;;  %v756_v34 = vadd.f32 %v4748_v5, %v4243_v50  ;;  %v4903_v50 = vld [vmem:[%s5415_s6] ss:$0 sm:$0xff]  ;;  %v2240_v5 = vld [vmem:[%s5414_s9 + $0x10] sm:$0xff] }
 0x226   :  { %v883_v27 = vmax.f32 %v750_v49, 0.0  ;;  %v3779_v46 = vpack.c.bf16 %v2241_v35, %v2240_v5 }
 0x227   :  { %v885_v61 = vmax.f32 %v756_v34, 0.0 }
 0x228   :  { %3385 = vmatmul.mubr.f32.gmra.mrb[102].mxu1 %v837_v26  ;;  %v2238_v26 = vld [vmem:[%s5414_s9] sm:$0xff] }
 0x229   :  { %3387 = vmatprep.mubr.f32.mxu1 %v839_v38  ;;  %v3775_v41 = vpack.c.bf16 %v2239_v28, %v2238_v26 }
 0x22b   :  { %3807 = vmatprep.subr.bf16.mxu1 %v3775_v41  ;;  %3776 = vmatprep.subr.bf16.mxu0 %v3775_v41 }
 0x22c   :  { %3388 = vmatmul.mubr.f32.gmra.mrb[104].mxu1 %v841_v12 }
 0x22d   :  { %3390 = vmatprep.mubr.f32.mxu1 %v843_v47  ;;  %3815 = vmatpush3.bf16.msra.mxu1 %v3775_v41 }
 0x22e   :  { %3808 = vmatprep.subr.bf16.mxu1 %v3779_v46 }
 0x230   :  { %3391 = vmatmul.mubr.f32.gmra.mrb[106].mxu1 %v845_v21  ;;  %v2243_v21 = vld [vmem:[%s5414_s9 + $0x28] sm:$0xff] }
 0x231   :  { %3393 = vmatprep.mubr.f32.mxu1 %v847_v53  ;;  %3816 = vmatpush3.bf16.msra.mxu1 %v3779_v46 }
 0x234   :  { %3394 = vmatmul.mubr.f32.gmra.mrb[108].mxu1 %v849_v60  ;;  %v3783_v60 = vpack.c.bf16 %v2243_v21, %v2242_v7 }
 0x235   :  { %3396 = vmatprep.mubr.f32.mxu1 %v851_v58 }
 0x236   :  { %3809 = vmatprep.subr.bf16.mxu1 %v3783_v60 }
 0x237   :  { %3817 = vmatpush3.bf16.msra.mxu1 %v3783_v60 }
 0x238   :  { %3397 = vmatmul.mubr.f32.gmra.mrb[110].mxu1 %v853_v62  ;;  %3810 = vmatprep.subr.bf16.mxu1 %v3787_v51 }
 0x239   :  { %3399 = vmatprep.mubr.f32.mxu1 %v855_v8  ;;  %v2247_v8 = vld [vmem:[%s5414_s9 + $0x48] sm:$0xff] }
 0x23a   :  { %v3791_v32 = vpack.c.bf16 %v2247_v8, %v2246_v3 }
 0x23b   :  { %3818 = vmatpush3.bf16.msra.mxu1 %v3787_v51 }
 0x23c   :  { %3400 = vmatmul.mubr.f32.gmra.mrb[112].mxu1 %v857_v13  ;;  %3811 = vmatprep.subr.bf16.mxu1 %v3791_v32 }
 0x23d   :  { %3402 = vmatprep.mubr.f32.mxu1 %v859_v18 }
 0x23f   :  { %3819 = vmatpush3.bf16.msra.mxu1 %v3791_v32 }
 0x240   :  { %3403 = vmatmul.mubr.f32.gmra.mrb[114].mxu1 %v861_v56  ;;  %v2249_v56 = vld [vmem:[%s5414_s9 + $0x58] sm:$0xff] }
 0x241   :  { %3405 = vmatprep.mubr.f32.mxu1 %v863_v40  ;;  %v3795_v57 = vpack.c.bf16 %v2249_v56, %v2248_v22 }
 0x243   :  { %3812 = vmatprep.subr.bf16.mxu1 %v3795_v57 }
 0x244   :  { %3406 = vmatmul.mubr.f32.gmra.mrb[116].mxu1 %v865_v39 }
 0x245   :  { %3408 = vmatprep.mubr.f32.mxu1 %v867_v4  ;;  %v2251_v4 = vld [vmem:[%s5414_s9 + $0x68] sm:$0xff]  ;;  %3820 = vmatpush3.bf16.msra.mxu1 %v3795_v57 }
 0x246   :  { %v3799_v16 = vpack.c.bf16 %v2251_v4, %v2250_v6 }
 0x248   :  { %3409 = vmatmul.mubr.f32.gmra.mrb[118].mxu1 %v869_v11  ;;  %3813 = vmatprep.subr.bf16.mxu1 %v3799_v16 }
 0x249   :  { %3411 = vmatprep.mubr.f32.mxu1 %v871_v24  ;;  %3821 = vmatpush3.bf16.msra.mxu1 %v3799_v16 }
 0x24c   :  { %3412 = vmatmul.mubr.f32.gmra.mrb[120].mxu1 %v873_v63 }
 0x24d   :  { %3414 = vmatprep.mubr.f32.mxu1 %v875_v55 }
 0x250   :  { %3415 = vmatmul.mubr.f32.gmra.mrb[122].mxu1 %v877_v1 }
 0x251   :  { %3417 = vmatprep.mubr.f32.mxu1 %v879_v9 }
 0x254   :  { %3418 = vmatmul.mubr.f32.gmra.mrb[124].mxu1 %v881_v19 }
 0x255   :  { %3420 = vmatprep.mubr.f32.mxu1 %v883_v27 }
 0x258   :  { %3421 = vmatmul.mubr.f32.gmra.mrb[126].mxu1 %v885_v61 }
 0x2af   :  { %v3329_v38 = vpop.f32.mrb[64].mxu1 }
 0x2b0   :  { %v1389_v12 = vadd.f32 %v3329_v38, %v4903_v50  ;;  %v1383_v54 = vpop.f32.mrb[65].mxu1 }
 0x2b1   :  { %v1384_v47 = vadd.f32 %v4903_v50, %v1383_v54 }
 0x2b2   :  { %v1703_v58 = vmax.f32 %v1389_v12, 0.0 }
 0x2b3   :  { %v1702_v53 = vmax.f32 %v1384_v47, 0.0  ;;  %v3332_v30 = vpop.f32.mrb[66].mxu1 }
 0x2b4   :  { %v1399_v45 = vadd.f32 %v3332_v30, %v4903_v50  ;;  %v1393_v59 = vpop.f32.mrb[67].mxu1 }
 0x2b5   :  { %v1394_v62 = vadd.f32 %v4903_v50, %v1393_v59  ;;  %3455 = vmatprep.mubr.f32.mxu0 %v1702_v53 }
 0x2b6   :  { %3456 = vmatmul.mubr.f32.vlgmr.msra.gmra.mrb[128].mxu0 %v1703_v58  ;;  %v1705_v13 = vmax.f32 %v1399_v45, 0.0 }
 0x2b7   :  { %v1704_v23 = vmax.f32 %v1394_v62, 0.0  ;;  %v3335_v15 = vpop.f32.mrb[68].mxu1  ;;  %3778 = vmatpush3.bf16.msra.mxu0 %v3775_v41 }
 0x2b8   :  { %v1409_v14 = vadd.f32 %v3335_v15, %v4903_v50  ;;  %v1403_v31 = vpop.f32.mrb[69].mxu1  ;;  %3780 = vmatprep.subr.bf16.mxu0 %v3779_v46 }
 0x2b9   :  { %v1404_v18 = vadd.f32 %v4903_v50, %v1403_v31  ;;  %3458 = vmatprep.mubr.f32.mxu0 %v1704_v23 }
 0x2ba   :  { %3459 = vmatmul.mubr.f32.gmra.mrb[130].mxu0 %v1705_v13  ;;  %v1707_v40 = vmax.f32 %v1409_v14, 0.0 }
 0x2bb   :  { %v1706_v33 = vmax.f32 %v1404_v18, 0.0  ;;  %v3338_v2 = vpop.f32.mrb[70].mxu1  ;;  %3782 = vmatpush3.bf16.msra.mxu0 %v3779_v46 }
 0x2bc   :  { %v1419_v0 = vadd.f32 %v3338_v2, %v4903_v50  ;;  %v1413_v44 = vpop.f32.mrb[71].mxu1  ;;  %3784 = vmatprep.subr.bf16.mxu0 %v3783_v60 }
 0x2bd   :  { %v1414_v39 = vadd.f32 %v4903_v50, %v1413_v44  ;;  %3461 = vmatprep.mubr.f32.mxu0 %v1706_v33 }
 0x2be   :  { %3462 = vmatmul.mubr.f32.gmra.mrb[132].mxu0 %v1707_v40  ;;  %v1709_v11 = vmax.f32 %v1419_v0, 0.0 }
 0x2bf   :  { %v1708_v48 = vmax.f32 %v1414_v39, 0.0  ;;  %v3341_v10 = vpop.f32.mrb[72].mxu1  ;;  %3786 = vmatpush3.bf16.msra.mxu0 %v3783_v60 }
 0x2c0   :  { %v1429_v17 = vadd.f32 %v3341_v10, %v4903_v50  ;;  %v1423_v37 = vpop.f32.mrb[73].mxu1  ;;  %3788 = vmatprep.subr.bf16.mxu0 %v3787_v51 }
 0x2c1   :  { %v1424_v24 = vadd.f32 %v4903_v50, %v1423_v37  ;;  %3464 = vmatprep.mubr.f32.mxu0 %v1708_v48 }
 0x2c2   :  { %3465 = vmatmul.mubr.f32.gmra.mrb[134].mxu0 %v1709_v11  ;;  %v1711_v43 = vmax.f32 %v1429_v17, 0.0 }
 0x2c3   :  { %v1710_v36 = vmax.f32 %v1424_v24, 0.0  ;;  %v3344_v63 = vpop.f32.mrb[74].mxu1  ;;  %3790 = vmatpush3.bf16.msra.mxu0 %v3787_v51 }
 0x2c4   :  { %v1439_v25 = vadd.f32 %v3344_v63, %v4903_v50  ;;  %v1433_v55 = vpop.f32.mrb[75].mxu1  ;;  %3792 = vmatprep.subr.bf16.mxu0 %v3791_v32 }
 0x2c5   :  { %v1434_v52 = vadd.f32 %v4903_v50, %v1433_v55  ;;  %3467 = vmatprep.mubr.f32.mxu0 %v1710_v36 }
 0x2c6   :  { %3468 = vmatmul.mubr.f32.gmra.mrb[136].mxu0 %v1711_v43  ;;  %v1713_v9 = vmax.f32 %v1439_v25, 0.0 }
 0x2c7   :  { %v1712_v1 = vmax.f32 %v1434_v52, 0.0  ;;  %v3347_v29 = vpop.f32.mrb[76].mxu1  ;;  %3794 = vmatpush3.bf16.msra.mxu0 %v3791_v32 }
 0x2c8   :  { %v1449_v49 = vadd.f32 %v3347_v29, %v4903_v50  ;;  %v1443_v19 = vpop.f32.mrb[77].mxu1  ;;  %3796 = vmatprep.subr.bf16.mxu0 %v3795_v57 }
 0x2c9   :  { %v1444_v34 = vadd.f32 %v4903_v50, %v1443_v19  ;;  %3470 = vmatprep.mubr.f32.mxu0 %v1712_v1 }
 0x2ca   :  { %3471 = vmatmul.mubr.f32.gmra.mrb[138].mxu0 %v1713_v9  ;;  %v1715_v26 = vmax.f32 %v1449_v49, 0.0 }
 0x2cb   :  { %v1714_v27 = vmax.f32 %v1444_v34, 0.0  ;;  %v3350_v61 = vpop.f32.mrb[78].mxu1  ;;  %3798 = vmatpush3.bf16.msra.mxu0 %v3795_v57 }
 0x2cc   :  { %v1459_v28 = vadd.f32 %v3350_v61, %v4903_v50  ;;  %v1453_v41 = vpop.f32.mrb[79].mxu1  ;;  %3800 = vmatprep.subr.bf16.mxu0 %v3799_v16 }
 0x2cd   :  { %v1454_v5 = vadd.f32 %v4903_v50, %v1453_v41  ;;  %3473 = vmatprep.mubr.f32.mxu0 %v1714_v27 }
 0x2ce   :  { %3474 = vmatmul.mubr.f32.gmra.mrb[140].mxu0 %v1715_v26  ;;  %v1717_v46 = vmax.f32 %v1459_v28, 0.0 }
 0x2cf   :  { %v1716_v35 = vmax.f32 %v1454_v5, 0.0  ;;  %v3353_v38 = vpop.f32.mrb[80].mxu1  ;;  %3802 = vmatpush3.bf16.msra.mxu0 %v3799_v16 }
 0x2d0   :  { %v1469_v12 = vadd.f32 %v3353_v38, %v4903_v50  ;;  %v1463_v54 = vpop.f32.mrb[81].mxu1 }
 0x2d1   :  { %v1464_v47 = vadd.f32 %v4903_v50, %v1463_v54  ;;  %3476 = vmatprep.mubr.f32.mxu0 %v1716_v35 }
 0x2d2   :  { %3477 = vmatmul.mubr.f32.gmra.mrb[142].mxu0 %v1717_v46  ;;  %v1719_v20 = vmax.f32 %v1469_v12, 0.0 }
 0x2d3   :  { %v1718_v7 = vmax.f32 %v1464_v47, 0.0  ;;  %v3356_v21 = vpop.f32.mrb[82].mxu1 }
 0x2d4   :  { %v1479_v53 = vadd.f32 %v3356_v21, %v4903_v50  ;;  %v1473_v30 = vpop.f32.mrb[83].mxu1 }
 0x2d5   :  { %v1474_v60 = vadd.f32 %v4903_v50, %v1473_v30  ;;  %3479 = vmatprep.mubr.f32.mxu0 %v1718_v7 }
 0x2d6   :  { %3480 = vmatmul.mubr.f32.gmra.mrb[144].mxu0 %v1719_v20  ;;  %v1721_v45 = vmax.f32 %v1479_v53, 0.0 }
 0x2d7   :  { %v1720_v42 = vmax.f32 %v1474_v60, 0.0  ;;  %v3359_v58 = vpop.f32.mrb[84].mxu1 }
 0x2d8   :  { %v1489_v59 = vadd.f32 %v3359_v58, %v4903_v50  ;;  %v1483_v62 = vpop.f32.mrb[85].mxu1 }
 0x2d9   :  { %v1484_v51 = vadd.f32 %v4903_v50, %v1483_v62  ;;  %3482 = vmatprep.mubr.f32.mxu0 %v1720_v42 }
 0x2da   :  { %3483 = vmatmul.mubr.f32.gmra.mrb[146].mxu0 %v1721_v45  ;;  %v1723_v23 = vmax.f32 %v1489_v59, 0.0 }
 0x2db   :  { %v1722_v3 = vmax.f32 %v1484_v51, 0.0  ;;  %v3362_v8 = vpop.f32.mrb[86].mxu1 }
 0x2dc   :  { %v1499_v15 = vadd.f32 %v3362_v8, %v4903_v50  ;;  %v1493_v13 = vpop.f32.mrb[87].mxu1 }
 0x2dd   :  { %v1494_v14 = vadd.f32 %v4903_v50, %v1493_v13  ;;  %3485 = vmatprep.mubr.f32.mxu0 %v1722_v3 }
 0x2de   :  { %3486 = vmatmul.mubr.f32.gmra.mrb[148].mxu0 %v1723_v23  ;;  %v1725_v32 = vmax.f32 %v1499_v15, 0.0 }
 0x2df   :  { %v1724_v31 = vmax.f32 %v1494_v14, 0.0  ;;  %v3365_v18 = vpop.f32.mrb[88].mxu1 }
 0x2e0   :  { %v1509_v22 = vadd.f32 %v3365_v18, %v4903_v50  ;;  %v1503_v56 = vpop.f32.mrb[89].mxu1 }
 0x2e1   :  { %v1504_v33 = vadd.f32 %v4903_v50, %v1503_v56  ;;  %3488 = vmatprep.mubr.f32.mxu0 %v1724_v31  ;;  %v2253_v56 = vld [vmem:[%s5414_s9 + $0x78] sm:$0xff] }
 0x2e2   :  { %3489 = vmatmul.mubr.f32.gmra.mrb[150].mxu0 %v1725_v32  ;;  %v1727_v0 = vmax.f32 %v1509_v22, 0.0  ;;  %v2252_v22 = vld [vmem:[%s5414_s9 + $0x70] sm:$0xff] }
 0x2e3   :  { %v1726_v2 = vmax.f32 %v1504_v33, 0.0  ;;  %v3368_v40 = vpop.f32.mrb[90].mxu1  ;;  %v3803_v33 = vpack.c.bf16 %v2253_v56, %v2252_v22 }
 0x2e4   :  { %v1519_v44 = vadd.f32 %v3368_v40, %v4903_v50  ;;  %v1513_v39 = vpop.f32.mrb[91].mxu1 }
 0x2e5   :  { %v1514_v57 = vadd.f32 %v4903_v50, %v1513_v39  ;;  %3491 = vmatprep.mubr.f32.mxu0 %v1726_v2  ;;  %3814 = vmatprep.subr.bf16.mxu1 %v3803_v33 }
 0x2e6   :  { %3492 = vmatmul.mubr.f32.gmra.mrb[152].mxu0 %v1727_v0  ;;  %v1729_v48 = vmax.f32 %v1519_v44, 0.0  ;;  %3804 = vmatprep.subr.bf16.mxu0 %v3803_v33 }
 0x2e7   :  { %v1728_v6 = vmax.f32 %v1514_v57, 0.0  ;;  %v3371_v4 = vpop.f32.mrb[92].mxu1  ;;  %3822 = vmatpush3.bf16.msra.mxu1 %v3803_v33  ;;  %3806 = vmatpush3.bf16.msra.mxu0 %v3803_v33 }
 0x2e8   :  { %v1529_v10 = vadd.f32 %v3371_v4, %v4903_v50  ;;  %v1523_v11 = vpop.f32.mrb[93].mxu1 }
 0x2e9   :  { %v1524_v17 = vadd.f32 %v4903_v50, %v1523_v11  ;;  %3494 = vmatprep.mubr.f32.mxu0 %v1728_v6 }
 0x2ea   :  { %3495 = vmatmul.mubr.f32.gmra.mrb[154].mxu0 %v1729_v48  ;;  %v1731_v16 = vmax.f32 %v1529_v10, 0.0 }
 0x2eb   :  { %v1730_v37 = vmax.f32 %v1524_v17, 0.0  ;;  %v3374_v24 = vpop.f32.mrb[94].mxu1 }
 0x2ec   :  { %v1539_v36 = vadd.f32 %v3374_v24, %v4903_v50  ;;  %v1533_v63 = vpop.f32.mrb[95].mxu1 }
 0x2ed   :  { %v1534_v43 = vadd.f32 %v4903_v50, %v1533_v63  ;;  %3497 = vmatprep.mubr.f32.mxu0 %v1730_v37 }
 0x2ee   :  { %3498 = vmatmul.mubr.f32.gmra.mrb[156].mxu0 %v1731_v16  ;;  %v1733_v52 = vmax.f32 %v1539_v36, 0.0 }
 0x2ef   :  { %v1732_v25 = vmax.f32 %v1534_v43, 0.0  ;;  %v3377_v55 = vpop.f32.mrb[96].mxu1 }
 0x2f0   :  { %v1549_v1 = vadd.f32 %v3377_v55, %v4903_v50  ;;  %v1543_v29 = vpop.f32.mrb[97].mxu1 }
 0x2f1   :  { %v1544_v9 = vadd.f32 %v4903_v50, %v1543_v29  ;;  %3500 = vmatprep.mubr.f32.mxu0 %v1732_v25 }
 0x2f2   :  { %3501 = vmatmul.mubr.f32.gmra.mrb[158].mxu0 %v1733_v52  ;;  %v1735_v34 = vmax.f32 %v1549_v1, 0.0 }
 0x2f3   :  { %v1734_v49 = vmax.f32 %v1544_v9, 0.0  ;;  %v3380_v19 = vpop.f32.mrb[98].mxu1 }
 0x2f4   :  { %v1559_v27 = vadd.f32 %v3380_v19, %v4903_v50  ;;  %v1553_v61 = vpop.f32.mrb[99].mxu1 }
 0x2f5   :  { %v1554_v26 = vadd.f32 %v4903_v50, %v1553_v61  ;;  %3503 = vmatprep.mubr.f32.mxu0 %v1734_v49 }
 0x2f6   :  { %3504 = vmatmul.mubr.f32.gmra.mrb[160].mxu0 %v1735_v34  ;;  %v1737_v5 = vmax.f32 %v1559_v27, 0.0 }
 0x2f7   :  { %v1736_v28 = vmax.f32 %v1554_v26, 0.0  ;;  %v3383_v41 = vpop.f32.mrb[100].mxu1 }
 0x2f8   :  { %v1569_v35 = vadd.f32 %v3383_v41, %v4903_v50  ;;  %v1563_v38 = vpop.f32.mrb[101].mxu1 }
 0x2f9   :  { %v1564_v46 = vadd.f32 %v4903_v50, %v1563_v38  ;;  %3506 = vmatprep.mubr.f32.mxu0 %v1736_v28 }
 0x2fa   :  { %3507 = vmatmul.mubr.f32.gmra.mrb[162].mxu0 %v1737_v5  ;;  %v1739_v47 = vmax.f32 %v1569_v35, 0.0 }
 0x2fb   :  { %v1738_v12 = vmax.f32 %v1564_v46, 0.0  ;;  %v3386_v54 = vpop.f32.mrb[102].mxu1 }
 0x2fc   :  { %v1579_v7 = vadd.f32 %v3386_v54, %v4903_v50  ;;  %v1573_v21 = vpop.f32.mrb[103].mxu1 }
 0x2fd   :  { %v1574_v20 = vadd.f32 %v4903_v50, %v1573_v21  ;;  %3509 = vmatprep.mubr.f32.mxu0 %v1738_v12 }
 0x2fe   :  { %3510 = vmatmul.mubr.f32.gmra.mrb[164].mxu0 %v1739_v47  ;;  %v1741_v60 = vmax.f32 %v1579_v7, 0.0 }
 0x2ff   :  { %v1740_v53 = vmax.f32 %v1574_v20, 0.0  ;;  %v3389_v30 = vpop.f32.mrb[104].mxu1 }
 0x300   :  { %v1589_v42 = vadd.f32 %v3389_v30, %v4903_v50  ;;  %v1583_v58 = vpop.f32.mrb[105].mxu1 }
 0x301   :  { %v1584_v45 = vadd.f32 %v4903_v50, %v1583_v58  ;;  %3512 = vmatprep.mubr.f32.mxu0 %v1740_v53 }
 0x302   :  { %3513 = vmatmul.mubr.f32.gmra.mrb[166].mxu0 %v1741_v60  ;;  %v1743_v51 = vmax.f32 %v1589_v42, 0.0 }
 0x303   :  { %v1742_v59 = vmax.f32 %v1584_v45, 0.0  ;;  %v3392_v62 = vpop.f32.mrb[106].mxu1 }
 0x304   :  { %v1599_v3 = vadd.f32 %v3392_v62, %v4903_v50  ;;  %v1593_v8 = vpop.f32.mrb[107].mxu1 }
 0x305   :  { %v1594_v23 = vadd.f32 %v4903_v50, %v1593_v8  ;;  %3515 = vmatprep.mubr.f32.mxu0 %v1742_v59 }
 0x306   :  { %3516 = vmatmul.mubr.f32.gmra.mrb[168].mxu0 %v1743_v51  ;;  %v1745_v14 = vmax.f32 %v1599_v3, 0.0 }
 0x307   :  { %v1744_v15 = vmax.f32 %v1594_v23, 0.0  ;;  %v3395_v13 = vpop.f32.mrb[108].mxu1 }
 0x308   :  { %v1609_v31 = vadd.f32 %v3395_v13, %v4903_v50  ;;  %v1603_v18 = vpop.f32.mrb[109].mxu1 }
 0x309   :  { %v1604_v32 = vadd.f32 %v4903_v50, %v1603_v18  ;;  %3518 = vmatprep.mubr.f32.mxu0 %v1744_v15 }
 0x30a   :  { %3519 = vmatmul.mubr.f32.gmra.mrb[170].mxu0 %v1745_v14  ;;  %v1747_v0 = vmax.f32 %v1609_v31, 0.0  ;;  %v5014_v14 = vld [vmem:[%s5416_s8] ss:$0 sm:$0xff] }
 0x30b   :  { %v1746_v2 = vmax.f32 %v1604_v32, 0.0  ;;  %v3398_v40 = vpop.f32.mrb[110].mxu1 }
 0x30c   :  { %v1619_v44 = vadd.f32 %v3398_v40, %v4903_v50  ;;  %v1613_v39 = vpop.f32.mrb[111].mxu1 }
 0x30d   :  { %v1614_v57 = vadd.f32 %v4903_v50, %v1613_v39  ;;  %3521 = vmatprep.mubr.f32.mxu0 %v1746_v2 }
 0x30e   :  { %3522 = vmatmul.mubr.f32.gmra.mrb[172].mxu0 %v1747_v0  ;;  %v1749_v48 = vmax.f32 %v1619_v44, 0.0 }
 0x30f   :  { %v1748_v6 = vmax.f32 %v1614_v57, 0.0  ;;  %v3401_v4 = vpop.f32.mrb[112].mxu1 }
 0x310   :  { %v1629_v10 = vadd.f32 %v3401_v4, %v4903_v50  ;;  %v1623_v11 = vpop.f32.mrb[113].mxu1 }
 0x311   :  { %v1624_v17 = vadd.f32 %v4903_v50, %v1623_v11  ;;  %3524 = vmatprep.mubr.f32.mxu0 %v1748_v6 }
 0x312   :  { %3525 = vmatmul.mubr.f32.gmra.mrb[174].mxu0 %v1749_v48  ;;  %v1751_v16 = vmax.f32 %v1629_v10, 0.0 }
 0x313   :  { %v1750_v37 = vmax.f32 %v1624_v17, 0.0  ;;  %v3404_v24 = vpop.f32.mrb[114].mxu1 }
 0x314   :  { %v1639_v36 = vadd.f32 %v3404_v24, %v4903_v50  ;;  %v1633_v63 = vpop.f32.mrb[115].mxu1 }
 0x315   :  { %v1634_v43 = vadd.f32 %v4903_v50, %v1633_v63  ;;  %3527 = vmatprep.mubr.f32.mxu0 %v1750_v37 }
 0x316   :  { %3528 = vmatmul.mubr.f32.gmra.mrb[176].mxu0 %v1751_v16  ;;  %v1753_v52 = vmax.f32 %v1639_v36, 0.0 }
 0x317   :  { %v1752_v25 = vmax.f32 %v1634_v43, 0.0  ;;  %v3407_v55 = vpop.f32.mrb[116].mxu1 }
 0x318   :  { %v1649_v1 = vadd.f32 %v3407_v55, %v4903_v50  ;;  %v1643_v29 = vpop.f32.mrb[117].mxu1 }
 0x319   :  { %v1644_v9 = vadd.f32 %v4903_v50, %v1643_v29  ;;  %3530 = vmatprep.mubr.f32.mxu0 %v1752_v25 }
 0x31a   :  { %3531 = vmatmul.mubr.f32.gmra.mrb[178].mxu0 %v1753_v52  ;;  %v1755_v34 = vmax.f32 %v1649_v1, 0.0 }
 0x31b   :  { %v1754_v49 = vmax.f32 %v1644_v9, 0.0  ;;  %v3410_v19 = vpop.f32.mrb[118].mxu1 }
 0x31c   :  { %v1659_v27 = vadd.f32 %v3410_v19, %v4903_v50  ;;  %v1653_v61 = vpop.f32.mrb[119].mxu1 }
 0x31d   :  { %v1654_v26 = vadd.f32 %v4903_v50, %v1653_v61  ;;  %3533 = vmatprep.mubr.f32.mxu0 %v1754_v49 }
 0x31e   :  { %3534 = vmatmul.mubr.f32.gmra.mrb[180].mxu0 %v1755_v34  ;;  %v1757_v5 = vmax.f32 %v1659_v27, 0.0 }
 0x31f   :  { %v1756_v28 = vmax.f32 %v1654_v26, 0.0  ;;  %v3413_v41 = vpop.f32.mrb[120].mxu1 }
 0x320   :  { %v1669_v35 = vadd.f32 %v3413_v41, %v4903_v50  ;;  %v1663_v38 = vpop.f32.mrb[121].mxu1 }
 0x321   :  { %v1664_v46 = vadd.f32 %v4903_v50, %v1663_v38  ;;  %3536 = vmatprep.mubr.f32.mxu0 %v1756_v28 }
 0x322   :  { %3537 = vmatmul.mubr.f32.gmra.mrb[182].mxu0 %v1757_v5  ;;  %v1759_v47 = vmax.f32 %v1669_v35, 0.0 }
 0x323   :  { %v1758_v12 = vmax.f32 %v1664_v46, 0.0  ;;  %v3416_v54 = vpop.f32.mrb[122].mxu1 }
 0x324   :  { %v1679_v7 = vadd.f32 %v3416_v54, %v4903_v50  ;;  %v1673_v21 = vpop.f32.mrb[123].mxu1 }
 0x325   :  { %v1674_v20 = vadd.f32 %v4903_v50, %v1673_v21  ;;  %3539 = vmatprep.mubr.f32.mxu0 %v1758_v12 }
 0x326   :  { %3540 = vmatmul.mubr.f32.gmra.mrb[184].mxu0 %v1759_v47  ;;  %v1761_v60 = vmax.f32 %v1679_v7, 0.0 }
 0x327   :  { %v1760_v53 = vmax.f32 %v1674_v20, 0.0  ;;  %v3419_v30 = vpop.f32.mrb[124].mxu1 }
 0x328   :  { %v1689_v42 = vadd.f32 %v3419_v30, %v4903_v50  ;;  %v1683_v58 = vpop.f32.mrb[125].mxu1 }
 0x329   :  { %v1684_v45 = vadd.f32 %v4903_v50, %v1683_v58  ;;  %3542 = vmatprep.mubr.f32.mxu0 %v1760_v53 }
 0x32a   :  { %3543 = vmatmul.mubr.f32.gmra.mrb[186].mxu0 %v1761_v60  ;;  %v1763_v51 = vmax.f32 %v1689_v42, 0.0 }
 0x32b   :  { %v1762_v59 = vmax.f32 %v1684_v45, 0.0  ;;  %v3422_v62 = vpop.f32.mrb[126].mxu1 }
 0x32c   :  { %v1699_v3 = vadd.f32 %v3422_v62, %v4903_v50  ;;  %v1693_v8 = vpop.f32.mrb[127].mxu1 }
 0x32d   :  { %v1694_v23 = vadd.f32 %v4903_v50, %v1693_v8  ;;  %3545 = vmatprep.mubr.f32.mxu0 %v1762_v59 }
 0x32e   :  { %3546 = vmatmul.mubr.f32.gmra.mrb[188].mxu0 %v1763_v51  ;;  %v1765_v13 = vmax.f32 %v1699_v3, 0.0 }
 0x32f   :  { %v1764_v15 = vmax.f32 %v1694_v23, 0.0 }
 0x331   :  { %3548 = vmatprep.mubr.f32.mxu0 %v1764_v15 }
 0x332   :  { %3549 = vmatmul.mubr.f32.gmra.mrb[190].mxu0 %v1765_v13 }
 0x389   :  { %v3457_v31 = vpop.f32.mrb[128].mxu0 }
 0x38a   :  { %v1861_v18 = vadd.f32 %v3457_v31, %v5014_v14  ;;  %v1855_v32 = vpop.f32.mrb[129].mxu0 }
 0x38b   :  { %v1856_v22 = vadd.f32 %v5014_v14, %v1855_v32 }
 0x38c   :  { %v2175_v50 = vmax.f32 %v1861_v18, 0.0 }
 0x38d   :  { %v2174_v56 = vmax.f32 %v1856_v22, 0.0  ;;  %v3460_v33 = vpop.f32.mrb[130].mxu0 }
 0x38e   :  { %v1871_v2 = vadd.f32 %v3460_v33, %v5014_v14  ;;  %v1865_v40 = vpop.f32.mrb[131].mxu0 }
 0x38f   :  { %v1866_v0 = vadd.f32 %v5014_v14, %v1865_v40  ;;  %3583 = vmatprep.mubr.f32.mxu0 %v2174_v56 }
 0x390   :  { %3584 = vmatmul.mubr.f32.vlgmr.msra.gmra.mrb[192].mxu0 %v2175_v50  ;;  %v2177_v57 = vmax.f32 %v1871_v2, 0.0 }
 0x391   :  { %v2176_v44 = vmax.f32 %v1866_v0, 0.0  ;;  %v3463_v39 = vpop.f32.mrb[132].mxu0 }
 0x392   :  { %v1881_v6 = vadd.f32 %v3463_v39, %v5014_v14  ;;  %v1875_v4 = vpop.f32.mrb[133].mxu0 }
 0x393   :  { %v1876_v48 = vadd.f32 %v5014_v14, %v1875_v4  ;;  %3586 = vmatprep.mubr.f32.mxu0 %v2176_v44 }
 0x394   :  { %3587 = vmatmul.mubr.f32.gmra.mrb[194].mxu0 %v2177_v57  ;;  %v2179_v17 = vmax.f32 %v1881_v6, 0.0 }
 0x395   :  { %v2178_v10 = vmax.f32 %v1876_v48, 0.0  ;;  %v3466_v11 = vpop.f32.mrb[134].mxu0 }
 0x396   :  { %v1891_v37 = vadd.f32 %v3466_v11, %v5014_v14  ;;  %v1885_v24 = vpop.f32.mrb[135].mxu0 }
 0x397   :  { %v1886_v16 = vadd.f32 %v5014_v14, %v1885_v24  ;;  %3589 = vmatprep.mubr.f32.mxu0 %v2178_v10 }
 0x398   :  { %3590 = vmatmul.mubr.f32.gmra.mrb[196].mxu0 %v2179_v17  ;;  %v2181_v43 = vmax.f32 %v1891_v37, 0.0 }
 0x399   :  { %v2180_v36 = vmax.f32 %v1886_v16, 0.0  ;;  %v3469_v63 = vpop.f32.mrb[136].mxu0 }
 0x39a   :  { %v1901_v25 = vadd.f32 %v3469_v63, %v5014_v14  ;;  %v1895_v55 = vpop.f32.mrb[137].mxu0 }
 0x39b   :  { %v1896_v52 = vadd.f32 %v5014_v14, %v1895_v55  ;;  %3592 = vmatprep.mubr.f32.mxu1 %v2180_v36 }
 0x39c   :  { %3593 = vmatmul.mubr.f32.vlgmr.msra.gmra.mrb[6].mxu1 %v2181_v43  ;;  %v2183_v9 = vmax.f32 %v1901_v25, 0.0 }
 0x39d   :  { %v2182_v1 = vmax.f32 %v1896_v52, 0.0  ;;  %v3472_v29 = vpop.f32.mrb[138].mxu0 }
 0x39e   :  { %v1911_v49 = vadd.f32 %v3472_v29, %v5014_v14  ;;  %v1905_v19 = vpop.f32.mrb[139].mxu0 }
 0x39f   :  { %v1906_v34 = vadd.f32 %v5014_v14, %v1905_v19  ;;  %3595 = vmatprep.mubr.f32.mxu1 %v2182_v1 }
 0x3a0   :  { %3596 = vmatmul.mubr.f32.gmra.mrb[8].mxu1 %v2183_v9  ;;  %v2185_v26 = vmax.f32 %v1911_v49, 0.0 }
 0x3a1   :  { %v2184_v27 = vmax.f32 %v1906_v34, 0.0  ;;  %v3475_v61 = vpop.f32.mrb[140].mxu0 }
 0x3a2   :  { %v1921_v28 = vadd.f32 %v3475_v61, %v5014_v14  ;;  %v1915_v41 = vpop.f32.mrb[141].mxu0 }
 0x3a3   :  { %v1916_v5 = vadd.f32 %v5014_v14, %v1915_v41  ;;  %3598 = vmatprep.mubr.f32.mxu1 %v2184_v27 }
 0x3a4   :  { %3599 = vmatmul.mubr.f32.gmra.mrb[10].mxu1 %v2185_v26  ;;  %v2187_v46 = vmax.f32 %v1921_v28, 0.0 }
 0x3a5   :  { %v2186_v35 = vmax.f32 %v1916_v5, 0.0  ;;  %v3478_v38 = vpop.f32.mrb[142].mxu0 }
 0x3a6   :  { %v1931_v12 = vadd.f32 %v3478_v38, %v5014_v14  ;;  %v1925_v54 = vpop.f32.mrb[143].mxu0 }
 0x3a7   :  { %v1926_v47 = vadd.f32 %v5014_v14, %v1925_v54  ;;  %3601 = vmatprep.mubr.f32.mxu1 %v2186_v35 }
 0x3a8   :  { %3602 = vmatmul.mubr.f32.gmra.mrb[12].mxu1 %v2187_v46  ;;  %v2189_v20 = vmax.f32 %v1931_v12, 0.0 }
 0x3a9   :  { %v2188_v7 = vmax.f32 %v1926_v47, 0.0  ;;  %v3481_v21 = vpop.f32.mrb[144].mxu0 }
 0x3aa   :  { %v1941_v53 = vadd.f32 %v3481_v21, %v5014_v14  ;;  %v1935_v30 = vpop.f32.mrb[145].mxu0 }
 0x3ab   :  { %v1936_v60 = vadd.f32 %v5014_v14, %v1935_v30  ;;  %3604 = vmatprep.mubr.f32.mxu1 %v2188_v7 }
 0x3ac   :  { %3605 = vmatmul.mubr.f32.gmra.mrb[14].mxu1 %v2189_v20  ;;  %v2191_v45 = vmax.f32 %v1941_v53, 0.0 }
 0x3ad   :  { %v2190_v42 = vmax.f32 %v1936_v60, 0.0  ;;  %v3484_v58 = vpop.f32.mrb[146].mxu0 }
 0x3ae   :  { %v1951_v59 = vadd.f32 %v3484_v58, %v5014_v14  ;;  %v1945_v62 = vpop.f32.mrb[147].mxu0 }
 0x3af   :  { %v1946_v51 = vadd.f32 %v5014_v14, %v1945_v62  ;;  %3607 = vmatprep.mubr.f32.mxu1 %v2190_v42 }
 0x3b0   :  { %3608 = vmatmul.mubr.f32.gmra.mrb[16].mxu1 %v2191_v45  ;;  %v2193_v23 = vmax.f32 %v1951_v59, 0.0 }
 0x3b1   :  { %v2192_v3 = vmax.f32 %v1946_v51, 0.0  ;;  %v3487_v8 = vpop.f32.mrb[148].mxu0 }
 0x3b2   :  { %v1961_v15 = vadd.f32 %v3487_v8, %v5014_v14  ;;  %v1955_v13 = vpop.f32.mrb[149].mxu0 }
 0x3b3   :  { %v1956_v31 = vadd.f32 %v5014_v14, %v1955_v13  ;;  %3610 = vmatprep.mubr.f32.mxu1 %v2192_v3 }
 0x3b4   :  { %3611 = vmatmul.mubr.f32.gmra.mrb[18].mxu1 %v2193_v23  ;;  %v2195_v22 = vmax.f32 %v1961_v15, 0.0 }
 0x3b5   :  { %v2194_v18 = vmax.f32 %v1956_v31, 0.0  ;;  %v3490_v32 = vpop.f32.mrb[150].mxu0 }
 0x3b6   :  { %v1971_v56 = vadd.f32 %v3490_v32, %v5014_v14  ;;  %v1965_v33 = vpop.f32.mrb[151].mxu0 }
 0x3b7   :  { %v1966_v50 = vadd.f32 %v5014_v14, %v1965_v33  ;;  %3613 = vmatprep.mubr.f32.mxu1 %v2194_v18 }
 0x3b8   :  { %3614 = vmatmul.mubr.f32.gmra.mrb[20].mxu1 %v2195_v22  ;;  %v2197_v0 = vmax.f32 %v1971_v56, 0.0 }
 0x3b9   :  { %v2196_v2 = vmax.f32 %v1966_v50, 0.0  ;;  %v3493_v40 = vpop.f32.mrb[152].mxu0 }
 0x3ba   :  { %v1981_v44 = vadd.f32 %v3493_v40, %v5014_v14  ;;  %v1975_v39 = vpop.f32.mrb[153].mxu0 }
 0x3bb   :  { %v1976_v57 = vadd.f32 %v5014_v14, %v1975_v39  ;;  %3616 = vmatprep.mubr.f32.mxu1 %v2196_v2 }
 0x3bc   :  { %3617 = vmatmul.mubr.f32.gmra.mrb[22].mxu1 %v2197_v0  ;;  %v2199_v48 = vmax.f32 %v1981_v44, 0.0 }
 0x3bd   :  { %v2198_v6 = vmax.f32 %v1976_v57, 0.0  ;;  %v3496_v4 = vpop.f32.mrb[154].mxu0 }
 0x3be   :  { %v1991_v10 = vadd.f32 %v3496_v4, %v5014_v14  ;;  %v1985_v11 = vpop.f32.mrb[155].mxu0 }
 0x3bf   :  { %v1986_v17 = vadd.f32 %v5014_v14, %v1985_v11  ;;  %3619 = vmatprep.mubr.f32.mxu1 %v2198_v6 }
 0x3c0   :  { %3620 = vmatmul.mubr.f32.gmra.mrb[24].mxu1 %v2199_v48  ;;  %v2201_v16 = vmax.f32 %v1991_v10, 0.0 }
 0x3c1   :  { %v2200_v37 = vmax.f32 %v1986_v17, 0.0  ;;  %v3499_v24 = vpop.f32.mrb[156].mxu0 }
 0x3c2   :  { %v2001_v36 = vadd.f32 %v3499_v24, %v5014_v14  ;;  %v1995_v63 = vpop.f32.mrb[157].mxu0 }
 0x3c3   :  { %v1996_v43 = vadd.f32 %v5014_v14, %v1995_v63  ;;  %3622 = vmatprep.mubr.f32.mxu1 %v2200_v37 }
 0x3c4   :  { %3623 = vmatmul.mubr.f32.gmra.mrb[26].mxu1 %v2201_v16  ;;  %v2203_v52 = vmax.f32 %v2001_v36, 0.0 }
 0x3c5   :  { %v2202_v25 = vmax.f32 %v1996_v43, 0.0  ;;  %v3502_v55 = vpop.f32.mrb[158].mxu0 }
 0x3c6   :  { %v2011_v1 = vadd.f32 %v3502_v55, %v5014_v14  ;;  %v2005_v29 = vpop.f32.mrb[159].mxu0 }
 0x3c7   :  { %v2006_v9 = vadd.f32 %v5014_v14, %v2005_v29  ;;  %3625 = vmatprep.mubr.f32.mxu1 %v2202_v25 }
 0x3c8   :  { %3626 = vmatmul.mubr.f32.gmra.mrb[28].mxu1 %v2203_v52  ;;  %v2205_v34 = vmax.f32 %v2011_v1, 0.0 }
 0x3c9   :  { %v2204_v49 = vmax.f32 %v2006_v9, 0.0  ;;  %v3505_v19 = vpop.f32.mrb[160].mxu0 }
 0x3ca   :  { %v2021_v27 = vadd.f32 %v3505_v19, %v5014_v14  ;;  %v2015_v61 = vpop.f32.mrb[161].mxu0 }
 0x3cb   :  { %v2016_v26 = vadd.f32 %v5014_v14, %v2015_v61  ;;  %3628 = vmatprep.mubr.f32.mxu1 %v2204_v49 }
 0x3cc   :  { %3629 = vmatmul.mubr.f32.gmra.mrb[30].mxu1 %v2205_v34  ;;  %v2207_v5 = vmax.f32 %v2021_v27, 0.0 }
 0x3cd   :  { %v2206_v28 = vmax.f32 %v2016_v26, 0.0  ;;  %v3508_v41 = vpop.f32.mrb[162].mxu0 }
 0x3ce   :  { %v2031_v35 = vadd.f32 %v3508_v41, %v5014_v14  ;;  %v2025_v38 = vpop.f32.mrb[163].mxu0 }
 0x3cf   :  { %v2026_v46 = vadd.f32 %v5014_v14, %v2025_v38  ;;  %3631 = vmatprep.mubr.f32.mxu1 %v2206_v28 }
 0x3d0   :  { %3632 = vmatmul.mubr.f32.gmra.mrb[32].mxu1 %v2207_v5  ;;  %v2209_v47 = vmax.f32 %v2031_v35, 0.0 }
 0x3d1   :  { %v2208_v12 = vmax.f32 %v2026_v46, 0.0  ;;  %v3511_v54 = vpop.f32.mrb[164].mxu0 }
 0x3d2   :  { %v2041_v7 = vadd.f32 %v3511_v54, %v5014_v14  ;;  %v2035_v21 = vpop.f32.mrb[165].mxu0 }
 0x3d3   :  { %v2036_v20 = vadd.f32 %v5014_v14, %v2035_v21  ;;  %3634 = vmatprep.mubr.f32.mxu1 %v2208_v12 }
 0x3d4   :  { %3635 = vmatmul.mubr.f32.gmra.mrb[34].mxu1 %v2209_v47  ;;  %v2211_v60 = vmax.f32 %v2041_v7, 0.0 }
 0x3d5   :  { %v2210_v53 = vmax.f32 %v2036_v20, 0.0  ;;  %v3514_v30 = vpop.f32.mrb[166].mxu0 }
 0x3d6   :  { %v2051_v42 = vadd.f32 %v3514_v30, %v5014_v14  ;;  %v2045_v58 = vpop.f32.mrb[167].mxu0 }
 0x3d7   :  { %v2046_v45 = vadd.f32 %v5014_v14, %v2045_v58  ;;  %3637 = vmatprep.mubr.f32.mxu1 %v2210_v53 }
 0x3d8   :  { %3638 = vmatmul.mubr.f32.gmra.mrb[36].mxu1 %v2211_v60  ;;  %v2213_v51 = vmax.f32 %v2051_v42, 0.0 }
 0x3d9   :  { %v2212_v59 = vmax.f32 %v2046_v45, 0.0  ;;  %v3517_v62 = vpop.f32.mrb[168].mxu0 }
 0x3da   :  { %v2061_v3 = vadd.f32 %v3517_v62, %v5014_v14  ;;  %v2055_v8 = vpop.f32.mrb[169].mxu0 }
 0x3db   :  { %v2056_v23 = vadd.f32 %v5014_v14, %v2055_v8  ;;  %3640 = vmatprep.mubr.f32.mxu1 %v2212_v59 }
 0x3dc   :  { %3641 = vmatmul.mubr.f32.gmra.mrb[38].mxu1 %v2213_v51  ;;  %v2215_v31 = vmax.f32 %v2061_v3, 0.0 }
 0x3dd   :  { %v2214_v15 = vmax.f32 %v2056_v23, 0.0  ;;  %v3520_v13 = vpop.f32.mrb[170].mxu0 }
 0x3de   :  { %v2071_v18 = vadd.f32 %v3520_v13, %v5014_v14  ;;  %v2065_v32 = vpop.f32.mrb[171].mxu0 }
 0x3df   :  { %v2066_v22 = vadd.f32 %v5014_v14, %v2065_v32  ;;  %3643 = vmatprep.mubr.f32.mxu1 %v2214_v15 }
 0x3e0   :  { %3644 = vmatmul.mubr.f32.gmra.mrb[40].mxu1 %v2215_v31  ;;  %v2217_v50 = vmax.f32 %v2071_v18, 0.0 }
 0x3e1   :  { %v2216_v56 = vmax.f32 %v2066_v22, 0.0  ;;  %v3523_v33 = vpop.f32.mrb[172].mxu0  ;;  %v2843_v22 = vld [vmem:[%s5417_s4] ss:$0 sm:$0xff] }
 0x3e2   :  { %v2081_v2 = vadd.f32 %v3523_v33, %v5014_v14  ;;  %v2075_v40 = vpop.f32.mrb[173].mxu0 }
 0x3e3   :  { %v2076_v0 = vadd.f32 %v5014_v14, %v2075_v40  ;;  %3646 = vmatprep.mubr.f32.mxu1 %v2216_v56  ;;  %v5450_v56 = vld [vmem:[#allocation9_spill] sm:$0xff]  ;;  %v5452_v40 = vld [vmem:[#allocation11_spill] sm:$0xff] }
 0x3e4   :  { %3647 = vmatmul.mubr.f32.gmra.mrb[42].mxu1 %v2217_v50  ;;  %v2219_v57 = vmax.f32 %v2081_v2, 0.0  ;;  %v981_v33 = vadd.f32 %v5450_v56, %v2843_v22  ;;  %v5451_v50 = vld [vmem:[#allocation13_spill] sm:$0xff] }
 0x3e5   :  { %v2218_v44 = vmax.f32 %v2076_v0, 0.0  ;;  %v3526_v39 = vpop.f32.mrb[174].mxu0  ;;  %v991_v2 = vadd.f32 %v5451_v50, %v2843_v22  ;;  %v976_v0 = vadd.f32 %v2843_v22, %v5452_v40 }
 0x3e6   :  { %v2091_v6 = vadd.f32 %v3526_v39, %v5014_v14  ;;  %v2085_v4 = vpop.f32.mrb[175].mxu0 }
 0x3e7   :  { %v2086_v48 = vadd.f32 %v5014_v14, %v2085_v4  ;;  %3649 = vmatprep.mubr.f32.mxu1 %v2218_v44  ;;  %v5453_v44 = vld [vmem:[#allocation15_spill] sm:$0xff] }
 0x3e8   :  { %3650 = vmatmul.mubr.f32.gmra.mrb[44].mxu1 %v2219_v57  ;;  %v2221_v17 = vmax.f32 %v2091_v6, 0.0  ;;  %v986_v39 = vadd.f32 %v2843_v22, %v5453_v44 }
 0x3e9   :  { %v2220_v10 = vmax.f32 %v2086_v48, 0.0  ;;  %v3529_v11 = vpop.f32.mrb[176].mxu0 }
 0x3ea   :  { %v2101_v37 = vadd.f32 %v3529_v11, %v5014_v14  ;;  %v2095_v24 = vpop.f32.mrb[177].mxu0 }
 0x3eb   :  { %v2096_v16 = vadd.f32 %v5014_v14, %v2095_v24  ;;  %3652 = vmatprep.mubr.f32.mxu1 %v2220_v10  ;;  %v5454_v10 = vld [vmem:[#allocation17_spill] sm:$0xff]  ;;  %v5455_v24 = vld [vmem:[#allocation19_spill] sm:$0xff] }
 0x3ec   :  { %3653 = vmatmul.mubr.f32.gmra.mrb[46].mxu1 %v2221_v17  ;;  %v2223_v43 = vmax.f32 %v2101_v37, 0.0  ;;  %v1001_v11 = vadd.f32 %v5454_v10, %v2843_v22 }
 0x3ed   :  { %v2222_v36 = vmax.f32 %v2096_v16, 0.0  ;;  %v3532_v63 = vpop.f32.mrb[178].mxu0  ;;  %v996_v16 = vadd.f32 %v2843_v22, %v5455_v24 }
 0x3ee   :  { %v2111_v25 = vadd.f32 %v3532_v63, %v5014_v14  ;;  %v2105_v55 = vpop.f32.mrb[179].mxu0 }
 0x3ef   :  { %v2106_v52 = vadd.f32 %v5014_v14, %v2105_v55  ;;  %3655 = vmatprep.mubr.f32.mxu1 %v2222_v36 }
 0x3f0   :  { %3656 = vmatmul.mubr.f32.gmra.mrb[48].mxu1 %v2223_v43  ;;  %v2225_v9 = vmax.f32 %v2111_v25, 0.0 }
 0x3f1   :  { %v2224_v1 = vmax.f32 %v2106_v52, 0.0  ;;  %v3535_v29 = vpop.f32.mrb[180].mxu0 }
 0x3f2   :  { %v2121_v49 = vadd.f32 %v3535_v29, %v5014_v14  ;;  %v2115_v19 = vpop.f32.mrb[181].mxu0 }
 0x3f3   :  { %v2116_v34 = vadd.f32 %v5014_v14, %v2115_v19  ;;  %3658 = vmatprep.mubr.f32.mxu1 %v2224_v1 }
 0x3f4   :  { %3659 = vmatmul.mubr.f32.gmra.mrb[50].mxu1 %v2225_v9  ;;  %v2227_v26 = vmax.f32 %v2121_v49, 0.0 }
 0x3f5   :  { %v2226_v27 = vmax.f32 %v2116_v34, 0.0  ;;  %v3538_v61 = vpop.f32.mrb[182].mxu0 }
 0x3f6   :  { %v2131_v28 = vadd.f32 %v3538_v61, %v5014_v14  ;;  %v2125_v41 = vpop.f32.mrb[183].mxu0 }
 0x3f7   :  { %v2126_v5 = vadd.f32 %v5014_v14, %v2125_v41  ;;  %3661 = vmatprep.mubr.f32.mxu1 %v2226_v27 }
 0x3f8   :  { %3662 = vmatmul.mubr.f32.gmra.mrb[52].mxu1 %v2227_v26  ;;  %v2229_v46 = vmax.f32 %v2131_v28, 0.0 }
 0x3f9   :  { %v2228_v35 = vmax.f32 %v2126_v5, 0.0  ;;  %v3541_v38 = vpop.f32.mrb[184].mxu0 }
 0x3fa   :  { %v2141_v12 = vadd.f32 %v3541_v38, %v5014_v14  ;;  %v2135_v54 = vpop.f32.mrb[185].mxu0 }
 0x3fb   :  { %v2136_v47 = vadd.f32 %v5014_v14, %v2135_v54  ;;  %3664 = vmatprep.mubr.f32.mxu1 %v2228_v35 }
 0x3fc   :  { %3665 = vmatmul.mubr.f32.gmra.mrb[54].mxu1 %v2229_v46  ;;  %v2231_v20 = vmax.f32 %v2141_v12, 0.0 }
 0x3fd   :  { %v2230_v7 = vmax.f32 %v2136_v47, 0.0  ;;  %v3544_v21 = vpop.f32.mrb[186].mxu0 }
 0x3fe   :  { %v2151_v53 = vadd.f32 %v3544_v21, %v5014_v14  ;;  %v2145_v30 = vpop.f32.mrb[187].mxu0 }
 0x3ff   :  { %v2146_v60 = vadd.f32 %v5014_v14, %v2145_v30  ;;  %3667 = vmatprep.mubr.f32.mxu1 %v2230_v7 }
 0x400   :  { %3668 = vmatmul.mubr.f32.gmra.mrb[56].mxu1 %v2231_v20  ;;  %v2233_v45 = vmax.f32 %v2151_v53, 0.0 }
 0x401   :  { %v2232_v42 = vmax.f32 %v2146_v60, 0.0  ;;  %v3547_v58 = vpop.f32.mrb[188].mxu0 }
 0x402   :  { %v2161_v59 = vadd.f32 %v3547_v58, %v5014_v14  ;;  %v2155_v62 = vpop.f32.mrb[189].mxu0 }
 0x403   :  { %v2156_v51 = vadd.f32 %v5014_v14, %v2155_v62  ;;  %3670 = vmatprep.mubr.f32.mxu1 %v2232_v42 }
 0x404   :  { %3671 = vmatmul.mubr.f32.gmra.mrb[58].mxu1 %v2233_v45  ;;  %v2235_v23 = vmax.f32 %v2161_v59, 0.0 }
 0x405   :  { %v2234_v3 = vmax.f32 %v2156_v51, 0.0  ;;  %v3550_v8 = vpop.f32.mrb[190].mxu0 }
 0x406   :  { %v2171_v15 = vadd.f32 %v3550_v8, %v5014_v14  ;;  %v2165_v13 = vpop.f32.mrb[191].mxu0 }
 0x407   :  { %v2166_v31 = vadd.f32 %v5014_v14, %v2165_v13  ;;  %3673 = vmatprep.mubr.f32.mxu1 %v2234_v3  ;;  %v2846_v14 = vld [vmem:[%s5418_s10] ss:$0 sm:$0xff] }
 0x408   :  { %3674 = vmatmul.mubr.f32.gmra.mrb[60].mxu1 %v2235_v23  ;;  %v2237_v32 = vmax.f32 %v2171_v15, 0.0  ;;  %v3830_v37 = vadd.f32 %v2846_v14, %v991_v2  ;;  %v3833_v43 = vadd.f32 %v2846_v14, %v986_v39  ;;  %v3836_v1 = vadd.f32 %v2846_v14, %v1001_v11 }
 0x409   :  { %v2236_v18 = vmax.f32 %v2166_v31, 0.0  ;;  %v3839_v9 = vadd.f32 %v2846_v14, %v996_v16  ;;  %v5108_v49 = vadd.f32 %v2846_v14, %v2843_v22 }
 0x40b   :  { %3676 = vmatprep.mubr.f32.mxu1 %v2236_v18 }
 0x40c   :  { %3677 = vmatmul.mubr.f32.gmra.mrb[62].mxu1 %v2237_v32 }
 0x463   :  { %v3585_v57 = vpop.f32.mrb[192].mxu0 }
 0x464   :  { %v3824_v6 = vadd.f32 %v3585_v57, %v981_v33  ;;  %v2327_v4 = vpop.f32.mrb[193].mxu0 }
 0x465   :  { %v3827_v48 = vadd.f32 %v2327_v4, %v976_v0 }
 0x466   :  { %v3825_v17 = vadd.f32 %v3824_v6, %v2846_v14 }
 0x467   :  { %v3828_v36 = vadd.f32 %v3827_v48, %v2846_v14  ;;  %v3588_v63 = vpop.f32.mrb[194].mxu0 }
 0x468   :  { %2712 = vst.msk [vmem:[%s5419_s11 + $0x8] sm:$0xff] %vm2710_vm1, %v3825_v17  ;;  %v3831_v25 = vadd.f32 %v3830_v37, %v3588_v63  ;;  %v2337_v55 = vpop.f32.mrb[195].mxu0 }
 0x469   :  { %2711 = vst.msk [vmem:[%s5419_s11] sm:$0xff] %vm2710_vm1, %v3828_v36  ;;  %v3834_v52 = vadd.f32 %v3833_v43, %v2337_v55 }
 0x46a   :  { %2714 = vst.msk [vmem:[%s5419_s11 + $0x18] sm:$0xff] %vm2710_vm1, %v3831_v25 }
 0x46b   :  { %2713 = vst.msk [vmem:[%s5419_s11 + $0x10] sm:$0xff] %vm2710_vm1, %v3834_v52  ;;  %v3591_v29 = vpop.f32.mrb[196].mxu0 }
 0x46c   :  { %v3837_v19 = vadd.f32 %v3836_v1, %v3591_v29  ;;  %v2347_v34 = vpop.f32.mrb[197].mxu0 }
 0x46d   :  { %v3840_v27 = vadd.f32 %v3839_v9, %v2347_v34 }
 0x46e   :  { %2716 = vst.msk [vmem:[%s5419_s11 + $0x28] sm:$0xff] %vm2710_vm1, %v3837_v19 }
 0x46f   :  { %2715 = vst.msk [vmem:[%s5419_s11 + $0x20] sm:$0xff] %vm2710_vm1, %v3840_v27  ;;  %v3594_v61 = vpop.f32.mrb[6].mxu1 }
 0x470   :  { %v3842_v26 = vadd.f32 %v5108_v49, %v3594_v61  ;;  %v2357_v28 = vpop.f32.mrb[7].mxu1 }
 0x471   :  { %v3844_v41 = vadd.f32 %v5108_v49, %v2357_v28 }
 0x472   :  { %2718 = vst.msk [vmem:[%s5419_s11 + $0x38] sm:$0xff] %vm2710_vm1, %v3842_v26 }
 0x473   :  { %2717 = vst.msk [vmem:[%s5419_s11 + $0x30] sm:$0xff] %vm2710_vm1, %v3844_v41  ;;  %v3597_v5 = vpop.f32.mrb[8].mxu1 }
 0x474   :  { %v3846_v35 = vadd.f32 %v5108_v49, %v3597_v5  ;;  %v2367_v38 = vpop.f32.mrb[9].mxu1 }
 0x475   :  { %v3848_v46 = vadd.f32 %v5108_v49, %v2367_v38 }
 0x476   :  { %2720 = vst.msk [vmem:[%s5419_s11 + $0x48] sm:$0xff] %vm2710_vm1, %v3846_v35 }
 0x477   :  { %2719 = vst.msk [vmem:[%s5419_s11 + $0x40] sm:$0xff] %vm2710_vm1, %v3848_v46  ;;  %v3600_v12 = vpop.f32.mrb[10].mxu1 }
 0x478   :  { %v3850_v54 = vadd.f32 %v5108_v49, %v3600_v12  ;;  %v2377_v47 = vpop.f32.mrb[11].mxu1 }
 0x479   :  { %v3852_v7 = vadd.f32 %v5108_v49, %v2377_v47 }
 0x47a   :  { %2722 = vst.msk [vmem:[%s5419_s11 + $0x58] sm:$0xff] %vm2710_vm1, %v3850_v54 }
 0x47b   :  { %2721 = vst.msk [vmem:[%s5419_s11 + $0x50] sm:$0xff] %vm2710_vm1, %v3852_v7  ;;  %v3603_v21 = vpop.f32.mrb[12].mxu1 }
 0x47c   :  { %v3854_v20 = vadd.f32 %v5108_v49, %v3603_v21  ;;  %v2387_v53 = vpop.f32.mrb[13].mxu1 }
 0x47d   :  { %v3856_v30 = vadd.f32 %v5108_v49, %v2387_v53 }
 0x47e   :  { %2724 = vst.msk [vmem:[%s5419_s11 + $0x68] sm:$0xff] %vm2710_vm1, %v3854_v20 }
 0x47f   :  { %2723 = vst.msk [vmem:[%s5419_s11 + $0x60] sm:$0xff] %vm2710_vm1, %v3856_v30  ;;  %v3606_v60 = vpop.f32.mrb[14].mxu1 }
 0x480   :  { %v3858_v42 = vadd.f32 %v5108_v49, %v3606_v60  ;;  %v2397_v58 = vpop.f32.mrb[15].mxu1 }
 0x481   :  { %v3860_v45 = vadd.f32 %v5108_v49, %v2397_v58 }
 0x482   :  { %2726 = vst.msk [vmem:[%s5419_s11 + $0x78] sm:$0xff] %vm2710_vm1, %v3858_v42 }
 0x483   :  { %2725 = vst.msk [vmem:[%s5419_s11 + $0x70] sm:$0xff] %vm2710_vm1, %v3860_v45  ;;  %v3609_v59 = vpop.f32.mrb[16].mxu1 }
 0x484   :  { %v3862_v62 = vadd.f32 %v5108_v49, %v3609_v59  ;;  %v2407_v51 = vpop.f32.mrb[17].mxu1 }
 0x485   :  { %v3864_v3 = vadd.f32 %v5108_v49, %v2407_v51 }
 0x486   :  { %2728 = vst.msk [vmem:[%s5419_s11 + $0x88] sm:$0xff] %vm2710_vm1, %v3862_v62 }
 0x487   :  { %2727 = vst.msk [vmem:[%s5419_s11 + $0x80] sm:$0xff] %vm2710_vm1, %v3864_v3  ;;  %v3612_v8 = vpop.f32.mrb[18].mxu1 }
 0x488   :  { %v3866_v23 = vadd.f32 %v5108_v49, %v3612_v8  ;;  %v2417_v15 = vpop.f32.mrb[19].mxu1 }
 0x489   :  { %v3868_v13 = vadd.f32 %v5108_v49, %v2417_v15 }
 0x48a   :  { %2730 = vst.msk [vmem:[%s5419_s11 + $0x98] sm:$0xff] %vm2710_vm1, %v3866_v23 }
 0x48b   :  { %2729 = vst.msk [vmem:[%s5419_s11 + $0x90] sm:$0xff] %vm2710_vm1, %v3868_v13  ;;  %v3615_v31 = vpop.f32.mrb[20].mxu1 }
 0x48c   :  { %v3870_v18 = vadd.f32 %v5108_v49, %v3615_v31  ;;  %v2427_v32 = vpop.f32.mrb[21].mxu1 }
 0x48d   :  { %v3872_v22 = vadd.f32 %v5108_v49, %v2427_v32 }
 0x48e   :  { %2732 = vst.msk [vmem:[%s5419_s11 + $0xa8] sm:$0xff] %vm2710_vm1, %v3870_v18 }
 0x48f   :  { %2731 = vst.msk [vmem:[%s5419_s11 + $0xa0] sm:$0xff] %vm2710_vm1, %v3872_v22  ;;  %v3618_v56 = vpop.f32.mrb[22].mxu1 }
 0x490   :  { %v3874_v33 = vadd.f32 %v5108_v49, %v3618_v56  ;;  %v2437_v50 = vpop.f32.mrb[23].mxu1 }
 0x491   :  { %v3876_v2 = vadd.f32 %v5108_v49, %v2437_v50 }
 0x492   :  { %2734 = vst.msk [vmem:[%s5419_s11 + $0xb8] sm:$0xff] %vm2710_vm1, %v3874_v33 }
 0x493   :  { %2733 = vst.msk [vmem:[%s5419_s11 + $0xb0] sm:$0xff] %vm2710_vm1, %v3876_v2  ;;  %v3621_v40 = vpop.f32.mrb[24].mxu1 }
 0x494   :  { %v3878_v0 = vadd.f32 %v5108_v49, %v3621_v40  ;;  %v2447_v44 = vpop.f32.mrb[25].mxu1 }
 0x495   :  { %v3880_v39 = vadd.f32 %v5108_v49, %v2447_v44 }
 0x496   :  { %2736 = vst.msk [vmem:[%s5419_s11 + $0xc8] sm:$0xff] %vm2710_vm1, %v3878_v0 }
 0x497   :  { %2735 = vst.msk [vmem:[%s5419_s11 + $0xc0] sm:$0xff] %vm2710_vm1, %v3880_v39  ;;  %v3624_v57 = vpop.f32.mrb[26].mxu1 }
 0x498   :  { %v3882_v14 = vadd.f32 %v5108_v49, %v3624_v57  ;;  %v2457_v6 = vpop.f32.mrb[27].mxu1 }
 0x499   :  { %v3884_v4 = vadd.f32 %v5108_v49, %v2457_v6 }
 0x49a   :  { %2738 = vst.msk [vmem:[%s5419_s11 + $0xd8] sm:$0xff] %vm2710_vm1, %v3882_v14 }
 0x49b   :  { %2737 = vst.msk [vmem:[%s5419_s11 + $0xd0] sm:$0xff] %vm2710_vm1, %v3884_v4  ;;  %v3627_v48 = vpop.f32.mrb[28].mxu1 }
 0x49c   :  { %v3886_v10 = vadd.f32 %v5108_v49, %v3627_v48  ;;  %v2467_v11 = vpop.f32.mrb[29].mxu1 }
 0x49d   :  { %v3888_v17 = vadd.f32 %v5108_v49, %v2467_v11 }
 0x49e   :  { %2740 = vst.msk [vmem:[%s5419_s11 + $0xe8] sm:$0xff] %vm2710_vm1, %v3886_v10 }
 0x49f   :  { %2739 = vst.msk [vmem:[%s5419_s11 + $0xe0] sm:$0xff] %vm2710_vm1, %v3888_v17  ;;  %v3630_v37 = vpop.f32.mrb[30].mxu1 }
 0x4a0   :  { %v3890_v24 = vadd.f32 %v5108_v49, %v3630_v37  ;;  %v2477_v16 = vpop.f32.mrb[31].mxu1 }
 0x4a1   :  { %v3892_v36 = vadd.f32 %v5108_v49, %v2477_v16 }
 0x4a2   :  { %2742 = vst.msk [vmem:[%s5419_s11 + $0xf8] sm:$0xff] %vm2710_vm1, %v3890_v24 }
 0x4a3   :  { %2741 = vst.msk [vmem:[%s5419_s11 + $0xf0] sm:$0xff] %vm2710_vm1, %v3892_v36  ;;  %v3633_v63 = vpop.f32.mrb[32].mxu1 }
 0x4a4   :  { %v3894_v43 = vadd.f32 %v5108_v49, %v3633_v63  ;;  %v2487_v25 = vpop.f32.mrb[33].mxu1 }
 0x4a5   :  { %v3896_v55 = vadd.f32 %v5108_v49, %v2487_v25 }
 0x4a6   :  { %2744 = vst.msk [vmem:[%s5419_s11 + $0x108] sm:$0xff] %vm2710_vm1, %v3894_v43 }
 0x4a7   :  { %2743 = vst.msk [vmem:[%s5419_s11 + $0x100] sm:$0xff] %vm2710_vm1, %v3896_v55  ;;  %v3636_v52 = vpop.f32.mrb[34].mxu1 }
 0x4a8   :  { %v3898_v1 = vadd.f32 %v5108_v49, %v3636_v52  ;;  %v2497_v29 = vpop.f32.mrb[35].mxu1 }
 0x4a9   :  { %v3900_v9 = vadd.f32 %v5108_v49, %v2497_v29 }
 0x4aa   :  { %2746 = vst.msk [vmem:[%s5419_s11 + $0x118] sm:$0xff] %vm2710_vm1, %v3898_v1 }
 0x4ab   :  { %2745 = vst.msk [vmem:[%s5419_s11 + $0x110] sm:$0xff] %vm2710_vm1, %v3900_v9  ;;  %v3639_v19 = vpop.f32.mrb[36].mxu1 }
 0x4ac   :  { %v3902_v34 = vadd.f32 %v5108_v49, %v3639_v19  ;;  %v2507_v27 = vpop.f32.mrb[37].mxu1 }
 0x4ad   :  { %v3904_v61 = vadd.f32 %v5108_v49, %v2507_v27 }
 0x4ae   :  { %2748 = vst.msk [vmem:[%s5419_s11 + $0x128] sm:$0xff] %vm2710_vm1, %v3902_v34 }
 0x4af   :  { %2747 = vst.msk [vmem:[%s5419_s11 + $0x120] sm:$0xff] %vm2710_vm1, %v3904_v61  ;;  %v3642_v26 = vpop.f32.mrb[38].mxu1 }
 0x4b0   :  { %v3906_v28 = vadd.f32 %v5108_v49, %v3642_v26  ;;  %v2517_v41 = vpop.f32.mrb[39].mxu1 }
 0x4b1   :  { %v3908_v5 = vadd.f32 %v5108_v49, %v2517_v41 }
 0x4b2   :  { %2750 = vst.msk [vmem:[%s5419_s11 + $0x138] sm:$0xff] %vm2710_vm1, %v3906_v28 }
 0x4b3   :  { %2749 = vst.msk [vmem:[%s5419_s11 + $0x130] sm:$0xff] %vm2710_vm1, %v3908_v5  ;;  %v3645_v35 = vpop.f32.mrb[40].mxu1 }
 0x4b4   :  { %v3910_v38 = vadd.f32 %v5108_v49, %v3645_v35  ;;  %v2527_v46 = vpop.f32.mrb[41].mxu1 }
 0x4b5   :  { %v3912_v12 = vadd.f32 %v5108_v49, %v2527_v46 }
 0x4b6   :  { %2752 = vst.msk [vmem:[%s5419_s11 + $0x148] sm:$0xff] %vm2710_vm1, %v3910_v38 }
 0x4b7   :  { %2751 = vst.msk [vmem:[%s5419_s11 + $0x140] sm:$0xff] %vm2710_vm1, %v3912_v12  ;;  %v3648_v54 = vpop.f32.mrb[42].mxu1 }
 0x4b8   :  { %v3914_v47 = vadd.f32 %v5108_v49, %v3648_v54  ;;  %v2537_v7 = vpop.f32.mrb[43].mxu1 }
 0x4b9   :  { %v3916_v21 = vadd.f32 %v5108_v49, %v2537_v7 }
 0x4ba   :  { %2754 = vst.msk [vmem:[%s5419_s11 + $0x158] sm:$0xff] %vm2710_vm1, %v3914_v47 }
 0x4bb   :  { %2753 = vst.msk [vmem:[%s5419_s11 + $0x150] sm:$0xff] %vm2710_vm1, %v3916_v21  ;;  %v3651_v20 = vpop.f32.mrb[44].mxu1 }
 0x4bc   :  { %v3918_v53 = vadd.f32 %v5108_v49, %v3651_v20  ;;  %v2547_v30 = vpop.f32.mrb[45].mxu1 }
 0x4bd   :  { %v3920_v60 = vadd.f32 %v5108_v49, %v2547_v30 }
 0x4be   :  { %2756 = vst.msk [vmem:[%s5419_s11 + $0x168] sm:$0xff] %vm2710_vm1, %v3918_v53 }
 0x4bf   :  { %2755 = vst.msk [vmem:[%s5419_s11 + $0x160] sm:$0xff] %vm2710_vm1, %v3920_v60  ;;  %v3654_v42 = vpop.f32.mrb[46].mxu1 }
 0x4c0   :  { %v3922_v58 = vadd.f32 %v5108_v49, %v3654_v42  ;;  %v2557_v45 = vpop.f32.mrb[47].mxu1 }
 0x4c1   :  { %v3924_v59 = vadd.f32 %v5108_v49, %v2557_v45 }
 0x4c2   :  { %2758 = vst.msk [vmem:[%s5419_s11 + $0x178] sm:$0xff] %vm2710_vm1, %v3922_v58 }
 0x4c3   :  { %2757 = vst.msk [vmem:[%s5419_s11 + $0x170] sm:$0xff] %vm2710_vm1, %v3924_v59  ;;  %v3657_v62 = vpop.f32.mrb[48].mxu1 }
 0x4c4   :  { %v3926_v51 = vadd.f32 %v5108_v49, %v3657_v62  ;;  %v2567_v3 = vpop.f32.mrb[49].mxu1 }
 0x4c5   :  { %v3928_v8 = vadd.f32 %v5108_v49, %v2567_v3 }
 0x4c6   :  { %2760 = vst.msk [vmem:[%s5419_s11 + $0x188] sm:$0xff] %vm2710_vm1, %v3926_v51 }
 0x4c7   :  { %2759 = vst.msk [vmem:[%s5419_s11 + $0x180] sm:$0xff] %vm2710_vm1, %v3928_v8  ;;  %v3660_v23 = vpop.f32.mrb[50].mxu1 }
 0x4c8   :  { %v3930_v15 = vadd.f32 %v5108_v49, %v3660_v23  ;;  %v2577_v13 = vpop.f32.mrb[51].mxu1 }
 0x4c9   :  { %v3932_v31 = vadd.f32 %v5108_v49, %v2577_v13 }
 0x4ca   :  { %2762 = vst.msk [vmem:[%s5419_s11 + $0x198] sm:$0xff] %vm2710_vm1, %v3930_v15 }
 0x4cb   :  { %2761 = vst.msk [vmem:[%s5419_s11 + $0x190] sm:$0xff] %vm2710_vm1, %v3932_v31  ;;  %v3663_v18 = vpop.f32.mrb[52].mxu1 }
 0x4cc   :  { %v3934_v32 = vadd.f32 %v5108_v49, %v3663_v18  ;;  %v2587_v22 = vpop.f32.mrb[53].mxu1 }
 0x4cd   :  { %v3936_v56 = vadd.f32 %v5108_v49, %v2587_v22 }
 0x4ce   :  { %2764 = vst.msk [vmem:[%s5419_s11 + $0x1a8] sm:$0xff] %vm2710_vm1, %v3934_v32 }
 0x4cf   :  { %2763 = vst.msk [vmem:[%s5419_s11 + $0x1a0] sm:$0xff] %vm2710_vm1, %v3936_v56  ;;  %v3666_v33 = vpop.f32.mrb[54].mxu1 }
 0x4d0   :  { %v3938_v50 = vadd.f32 %v5108_v49, %v3666_v33  ;;  %v2597_v2 = vpop.f32.mrb[55].mxu1 }
 0x4d1   :  { %v3940_v40 = vadd.f32 %v5108_v49, %v2597_v2 }
 0x4d2   :  { %2766 = vst.msk [vmem:[%s5419_s11 + $0x1b8] sm:$0xff] %vm2710_vm1, %v3938_v50 }
 0x4d3   :  { %2765 = vst.msk [vmem:[%s5419_s11 + $0x1b0] sm:$0xff] %vm2710_vm1, %v3940_v40  ;;  %v3669_v0 = vpop.f32.mrb[56].mxu1 }
 0x4d4   :  { %v3942_v44 = vadd.f32 %v5108_v49, %v3669_v0  ;;  %v2607_v39 = vpop.f32.mrb[57].mxu1 }
 0x4d5   :  { %v3944_v57 = vadd.f32 %v5108_v49, %v2607_v39 }
 0x4d6   :  { %2768 = vst.msk [vmem:[%s5419_s11 + $0x1c8] sm:$0xff] %vm2710_vm1, %v3942_v44 }
 0x4d7   :  { %2767 = vst.msk [vmem:[%s5419_s11 + $0x1c0] sm:$0xff] %vm2710_vm1, %v3944_v57  ;;  %v3672_v14 = vpop.f32.mrb[58].mxu1 }
 0x4d8   :  { %v3946_v6 = vadd.f32 %v5108_v49, %v3672_v14  ;;  %v2617_v4 = vpop.f32.mrb[59].mxu1 }
 0x4d9   :  { %v3948_v48 = vadd.f32 %v5108_v49, %v2617_v4 }
 0x4da   :  { %2770 = vst.msk [vmem:[%s5419_s11 + $0x1d8] sm:$0xff] %vm2710_vm1, %v3946_v6 }
 0x4db   :  { %2769 = vst.msk [vmem:[%s5419_s11 + $0x1d0] sm:$0xff] %vm2710_vm1, %v3948_v48  ;;  %v3675_v10 = vpop.f32.mrb[60].mxu1 }
 0x4dc   :  { %v3950_v11 = vadd.f32 %v5108_v49, %v3675_v10  ;;  %v2627_v17 = vpop.f32.mrb[61].mxu1 }
 0x4dd   :  { %v3952_v37 = vadd.f32 %v5108_v49, %v2627_v17 }
 0x4de   :  { %2772 = vst.msk [vmem:[%s5419_s11 + $0x1e8] sm:$0xff] %vm2710_vm1, %v3950_v11 }
 0x4df   :  { %2771 = vst.msk [vmem:[%s5419_s11 + $0x1e0] sm:$0xff] %vm2710_vm1, %v3952_v37  ;;  %v3678_v24 = vpop.f32.mrb[62].mxu1 }
 0x4e0   :  { %v3954_v16 = vadd.f32 %v5108_v49, %v3678_v24  ;;  %v2637_v36 = vpop.f32.mrb[63].mxu1 }
 0x4e1   :  { %v3956_v63 = vadd.f32 %v5108_v49, %v2637_v36 }
 0x4e2   :  { %2774 = vst.msk [vmem:[%s5419_s11 + $0x1f8] sm:$0xff] %vm2710_vm1, %v3954_v16 }
 0x4e3   :  { %2773 = vst.msk [vmem:[%s5419_s11 + $0x1f0] sm:$0xff] %vm2710_vm1, %v3956_v63 }

</bundles_post_ra>
